<compile_context>
chip_gen: v5e
topology: v5e:2x2
jax: 0.10.0
libtpu: 0.0.40
codegen_flags: <defaults>
</compile_context>

<pallas_src>
import functools
import math

import jax
import jax.numpy as jnp
from jax.experimental import pallas as pl
from jax.experimental.pallas import tpu as pltpu

_MAX_ROW_TILE = 1024


def _query_vmem_bytes():
    try:
        return int(pltpu.get_tpu_info().vmem_capacity_bytes)
    except Exception:
        return 64 * 1024 * 1024  # conservative: v7x per-TensorCore VMEM


_VMEM_PHYS_BYTES = _query_vmem_bytes()
# Request 3/4 of physical VMEM (96 MiB on v5e/v6e, 48 MiB on v7x) and size
# tiles against 3/4 of that so double-buffering slack remains.
_VMEM_LIMIT_BYTES = min((_VMEM_PHYS_BYTES * 3) // 4, 96 * 1024 * 1024)
_VMEM_TILE_BUDGET = (_VMEM_LIMIT_BYTES * 3) // 4


# ---------------------------------------------------------------------------
# Tile-size helpers
# ---------------------------------------------------------------------------
def _pick_row_tile(rows, bytes_per_row, fixed_bytes, itemsize, min_rows=256):
    """Largest row tile that fits the VMEM budget (mem-bound => go big)."""
    sub = 16 if itemsize == 2 else 8  # bf16 sublane packing wants multiples of 16
    avail = _VMEM_TILE_BUDGET - fixed_bytes
    cap = max(avail, 0) // max(bytes_per_row, 1)
    # Never starve the MXU: keep at least `min_rows` rows even if the budget
    # heuristic would shrink further (budget < limit leaves slack for this).
    cap = min(_MAX_ROW_TILE, max(cap, min_rows))
    if rows <= cap:
        return rows  # full extent: always a legal block shape
    return max(sub, (cap // sub) * sub)


def _pick_col_tile(n, max_tile):
    """Column tile (multiple of 128) that evenly divides n, else full n."""
    if n <= max_tile:
        return n
    t = (max_tile // 128) * 128
    while t >= 128:
        if n % t == 0:
            return t
        t -= 128
    # TODO(synk): pad odd column dims to a multiple of 128 instead of this fallback.
    return n


def _compiler_params(semantics):
    return pltpu.CompilerParams(
        dimension_semantics=semantics,
        vmem_limit_bytes=_VMEM_LIMIT_BYTES,
    )


# ---------------------------------------------------------------------------
# RoPE tables (host-side constants): half-width cos/sin, since the full tables
# are cat([freqs, freqs]) -> both halves are identical.
# ---------------------------------------------------------------------------
def _rope_cos_sin_half(seq_len, head_dim, base=10000.0):
    inv_freq = 1.0 / (base ** (jnp.arange(0, head_dim, 2, dtype=jnp.float32) / head_dim))
    t = jnp.arange(seq_len, dtype=jnp.float32)
    freqs = jnp.einsum("i,j->ij", t, inv_freq)  # (S, hd/2)
    return jnp.cos(freqs), jnp.sin(freqs)


# ---------------------------------------------------------------------------
# Kernel 1: fused RMSNorm + matmul (QKV projection). The normalized rows are
# computed once per row tile into a VMEM scratch and reused for every column
# tile (the column axis is "arbitrary" because of that carried scratch).
# ---------------------------------------------------------------------------
def _rmsnorm_matmul_kernel(x_ref, nw_ref, w_ref, o_ref, xn_ref, *, eps):
    j = pl.program_id(1)

    @pl.when(j == 0)
    def _():
        # NOTE: if rows % tm != 0 the pad rows hold unspecified data; they are
        # dropped on writeback and never reduced across rows, so this is safe.
        x = x_ref[...].astype(jnp.float32)
        ms = jnp.sum(x * x, axis=-1, keepdims=True) * (1.0 / x.shape[-1])
        xn = x * jax.lax.rsqrt(ms + eps) * nw_ref[...].astype(jnp.float32)
        xn_ref[...] = xn.astype(xn_ref.dtype)

    o_ref[...] = jnp.dot(
        xn_ref[...], w_ref[...], preferred_element_type=jnp.float32
    ).astype(o_ref.dtype)


def fused_rmsnorm_matmul(x2, norm_w, w, eps):
    rows, dim = x2.shape
    n = w.shape[1]
    xsize = jnp.dtype(x2.dtype).itemsize
    wsize = jnp.dtype(w.dtype).itemsize
    tn = _pick_col_tile(n, 512)
    # double-buffered weight tile + norm weight
    fixed = 2 * dim * tn * wsize + dim * 4
    # x (2 bufs) + out (2 bufs) + xn scratch + f32 norm temps
    per_row = 2 * dim * xsize + 2 * tn * xsize + dim * xsize + dim * 4
    tm = _pick_row_tile(rows, per_row, fixed, xsize)
    grid = (pl.cdiv(rows, tm), pl.cdiv(n, tn))
    return pl.pallas_call(
        functools.partial(_rmsnorm_matmul_kernel, eps=eps),
        out_shape=jax.ShapeDtypeStruct((rows, n), x2.dtype),
        grid_spec=pltpu.PrefetchScalarGridSpec(
            num_scalar_prefetch=0,
            grid=grid,
            in_specs=[
                pl.BlockSpec((tm, dim), lambda i, j: (i, 0)),
                pl.BlockSpec((1, dim), lambda i, j: (0, 0)),
                pl.BlockSpec((dim, tn), lambda i, j: (0, j)),
            ],
            out_specs=pl.BlockSpec((tm, tn), lambda i, j: (i, j)),
            scratch_shapes=[pltpu.VMEM((tm, dim), x2.dtype)],
        ),
        compiler_params=_compiler_params(("parallel", "arbitrary")),
    )(x2, norm_w.reshape(1, dim), w)


# ---------------------------------------------------------------------------
# Kernel 2: multi-query attention. Grid over batch only; QKV read in the flat
# (S, H*hd + 2*hd) layout, RoPE applied in split-half form:
#   out_first  = a*cos - b*sin
#   out_second = b*cos + a*sin         (a, b = first/second halves of a head)
# so the rotation is pure elementwise math (no hd x hd matmul, no lane rolls),
# and q.k^T = q1.k1^T + q2.k2^T. The single KV head's RoPE, the causal mask
# and the rope tables are shared across all heads (computed once per batch).
# ---------------------------------------------------------------------------
def _mqa_attn_kernel(qkv_ref, cos_ref, sin_ref, o_ref, *, num_heads, head_dim, scale):
    nq = num_heads * head_dim
    half = head_dim // 2

    qkv = qkv_ref[...]
    mm_dtype = qkv.dtype
    cos = cos_ref[...].astype(jnp.float32)  # (S, half)
    sin = sin_ref[...].astype(jnp.float32)

    # Shared single KV head.
    ka = qkv[:, nq:nq + half].astype(jnp.float32)
    kb = qkv[:, nq + half:nq + head_dim].astype(jnp.float32)
    k1 = (ka * cos - kb * sin).astype(mm_dtype)
    k2 = (kb * cos + ka * sin).astype(mm_dtype)
    v = qkv[:, nq + head_dim:nq + 2 * head_dim]

    seq = qkv.shape[0]
    row = jax.lax.broadcasted_iota(jnp.int32, (seq, seq), 0)
    col = jax.lax.broadcasted_iota(jnp.int32, (seq, seq), 1)
    mask_bias = jnp.where(col > row, -jnp.inf, 0.0).astype(jnp.float32)

    dot_dims = (((1,), (1,)), ((), ()))
    for h in range(num_heads):
        qa = qkv[:, h * head_dim:h * head_dim + half].astype(jnp.float32)
        qb = qkv[:, h * head_dim + half:(h + 1) * head_dim].astype(jnp.float32)
        q1 = (qa * cos - qb * sin).astype(mm_dtype)
        q2 = (qb * cos + qa * sin).astype(mm_dtype)

        s = jax.lax.dot_general(q1, k1, dot_dims, preferred_element_type=jnp.float32)
        s = s + jax.lax.dot_general(q2, k2, dot_dims, preferred_element_type=jnp.float32)
        s = s * scale + mask_bias
        s = s - jnp.max(s, axis=-1, keepdims=True)
        p = jnp.exp(s)
        p = p * pl.reciprocal(jnp.sum(p, axis=-1, keepdims=True), approx=True)
        # TODO(synk): attention dropout (module default p=0.0 -> identity).

        ctx = jnp.dot(p.astype(v.dtype), v, preferred_element_type=jnp.float32)
        o_ref[:, h * head_dim:(h + 1) * head_dim] = ctx.astype(o_ref.dtype)


def mqa_attention(qkv2, cos, sin, *, batch, seq, num_heads, head_dim, out_dtype):
    # TODO(synk): flash-style KV tiling (online softmax) for long sequences;
    # the dense (S, S) score tile won't scale past ~2k tokens on v7x VMEM.
    nq = num_heads * head_dim
    dqkv = qkv2.shape[1]
    scale = 1.0 / math.sqrt(head_dim)
    kernel = functools.partial(
        _mqa_attn_kernel, num_heads=num_heads, head_dim=head_dim, scale=scale
    )
    return pl.pallas_call(
        kernel,
        out_shape=jax.ShapeDtypeStruct((batch * seq, nq), out_dtype),
        grid_spec=pltpu.PrefetchScalarGridSpec(
            num_scalar_prefetch=0,
            grid=(batch,),
            in_specs=[
                pl.BlockSpec((seq, dqkv), lambda b: (b, 0)),
                pl.BlockSpec((seq, head_dim // 2), lambda b: (0, 0)),
                pl.BlockSpec((seq, head_dim // 2), lambda b: (0, 0)),
            ],
            out_specs=pl.BlockSpec((seq, nq), lambda b: (b, 0)),
        ),
        compiler_params=_compiler_params(("parallel",)),
    )(qkv2, cos, sin)


# ---------------------------------------------------------------------------
# Kernel 3: o_proj (column-tiled weight so it stays feasible at Llama scale on
# v7x's 64 MiB VMEM) + residual add.
# ---------------------------------------------------------------------------
def _matmul_residual_kernel(x_ref, w_ref, r_ref, o_ref):
    y = jnp.dot(x_ref[...], w_ref[...], preferred_element_type=jnp.float32)
    o_ref[...] = (r_ref[...].astype(jnp.float32) + y).astype(o_ref.dtype)


def matmul_residual(x2, w, resid2):
    rows, kdim = x2.shape
    n = w.shape[1]
    xsize = jnp.dtype(x2.dtype).itemsize
    wsize = jnp.dtype(w.dtype).itemsize
    tn = _pick_col_tile(n, 512)
    fixed = 2 * kdim * tn * wsize                       # double-buffered weight tile
    per_row = 2 * kdim * xsize + 4 * tn * xsize + tn * 4  # x + resid/out blocks + f32 temp
    tm = _pick_row_tile(rows, per_row, fixed, xsize)
    grid = (pl.cdiv(rows, tm), pl.cdiv(n, tn))
    return pl.pallas_call(
        _matmul_residual_kernel,
        out_shape=jax.ShapeDtypeStruct((rows, n), x2.dtype),
        grid_spec=pltpu.PrefetchScalarGridSpec(
            num_scalar_prefetch=0,
            grid=grid,
            in_specs=[
                pl.BlockSpec((tm, kdim), lambda i, j: (i, 0)),
                pl.BlockSpec((kdim, tn), lambda i, j: (0, j)),
                pl.BlockSpec((tm, tn), lambda i, j: (i, j)),
            ],
            out_specs=pl.BlockSpec((tm, tn), lambda i, j: (i, j)),
        ),
        compiler_params=_compiler_params(("parallel", "parallel")),
    )(x2, w, resid2)


# ---------------------------------------------------------------------------
# Kernel 4: fused RMSNorm + SwiGLU MLP + residual. Hidden dim is an "arbitrary"
# accumulation grid axis; the normalized rows and the residual are computed
# once per row tile (j == 0) into VMEM scratch and reused.
# ---------------------------------------------------------------------------
def _rmsnorm_swiglu_kernel(x_ref, nw_ref, wg_ref, wu_ref, wd_ref, o_ref,
                           xn_ref, acc_ref, *, eps):
    j = pl.program_id(1)

    @pl.when(j == 0)
    def _():
        x = x_ref[...].astype(jnp.float32)
        acc_ref[...] = x  # residual term
        ms = jnp.sum(x * x, axis=-1, keepdims=True) * (1.0 / x.shape[-1])
        xn = x * jax.lax.rsqrt(ms + eps) * nw_ref[...].astype(jnp.float32)
        xn_ref[...] = xn.astype(xn_ref.dtype)

    xn = xn_ref[...]
    g = jnp.dot(xn, wg_ref[...], preferred_element_type=jnp.float32)
    u = jnp.dot(xn, wu_ref[...], preferred_element_type=jnp.float32)
    h = (g * (1.0 / (1.0 + jnp.exp(-g)))) * u  # SiLU(gate) * up, f32 elementwise
    acc_ref[...] += jnp.dot(
        h.astype(wd_ref.dtype), wd_ref[...], preferred_element_type=jnp.float32
    )
    # TODO(synk): MLP dropout (module default p=0.0 -> identity).

    @pl.when(j == pl.num_programs(1) - 1)
    def _():
        o_ref[...] = acc_ref[...].astype(o_ref.dtype)


def fused_rmsnorm_swiglu(x2, norm_w, wg, wu, wd, eps):
    rows, dim = x2.shape
    hidden = wg.shape[1]
    xsize = jnp.dtype(x2.dtype).itemsize
    wsize = jnp.dtype(wg.dtype).itemsize
    # Keep the three double-buffered weight tiles under ~half the VMEM budget.
    th_cap = (_VMEM_TILE_BUDGET // 2) // max(6 * dim * wsize, 1)
    th_max = max(128, min(2048, (th_cap // 128) * 128))
    th = _pick_col_tile(hidden, th_max)
    fixed = 2 * 3 * dim * th * wsize + dim * 4
    per_row = (2 * dim * xsize      # x blocks
               + 2 * dim * xsize    # out blocks
               + dim * xsize        # xn scratch
               + dim * 4            # acc scratch (f32)
               + 2 * th * 4         # g/u f32 temps
               + dim * 4)           # misc f32 temps
    tm = _pick_row_tile(rows, per_row, fixed, xsize)
    grid = (pl.cdiv(rows, tm), pl.cdiv(hidden, th))
    return pl.pallas_call(
        functools.partial(_rmsnorm_swiglu_kernel, eps=eps),
        out_shape=jax.ShapeDtypeStruct((rows, dim), x2.dtype),
        grid_spec=pltpu.PrefetchScalarGridSpec(
            num_scalar_prefetch=0,
            grid=grid,
            in_specs=[
                pl.BlockSpec((tm, dim), lambda i, j: (i, 0)),
                pl.BlockSpec((1, dim), lambda i, j: (0, 0)),
                pl.BlockSpec((dim, th), lambda i, j: (0, j)),
                pl.BlockSpec((dim, th), lambda i, j: (0, j)),
                pl.BlockSpec((th, dim), lambda i, j: (j, 0)),
            ],
            out_specs=pl.BlockSpec((tm, dim), lambda i, j: (i, 0)),
            scratch_shapes=[
                pltpu.VMEM((tm, dim), x2.dtype),
                pltpu.VMEM((tm, dim), jnp.float32),
            ],
        ),
        compiler_params=_compiler_params(("parallel", "arbitrary")),
    )(x2, norm_w.reshape(1, dim), wg, wu, wd)


# ---------------------------------------------------------------------------
# Parameter preprocessing (one-time; hoisted out of the forward pass)
# ---------------------------------------------------------------------------
def prepare_params(params):
    p = dict(params)
    p["Wqkv"] = jnp.concatenate([params["Wq"], params["Wk"], params["Wv"]], axis=1)
    return p


# ---------------------------------------------------------------------------
# Full Llama2Block forward
# ---------------------------------------------------------------------------
def llama2_block(x, params, num_heads, eps=1e-6):
    """x: (B, S, D). Weights stored as [in, out] (transposed nn.Linear)."""
    b, s, d = x.shape
    hd = params["Wk"].shape[1]
    nq = num_heads * hd
    rows = b * s
    x2 = x.reshape(rows, d)

    # 1) attn RMSNorm fused with the (pre-concatenated) QKV projection.
    w_qkv = params.get("Wqkv")
    if w_qkv is None:  # fallback if prepare_params was not called
        w_qkv = jnp.concatenate([params["Wq"], params["Wk"], params["Wv"]], axis=1)
    qkv2 = fused_rmsnorm_matmul(x2, params["attn_norm_w"], w_qkv, eps)  # (rows, nq+2hd)

    # 2) MQA attention (RoPE + causal softmax inside the kernel), no transposes:
    #    consumes the flat QKV layout, writes ctx as (rows, H*hd) directly.
    cos, sin = _rope_cos_sin_half(s, hd)
    ctx2 = mqa_attention(qkv2, cos, sin, batch=b, seq=s, num_heads=num_heads,
                         head_dim=hd, out_dtype=x.dtype)               # (rows, nq)

    # 3) o_proj fused with the attention residual add.
    h2 = matmul_residual(ctx2, params["Wo"], x2)

    # 4) mlp RMSNorm fused with SwiGLU MLP and the MLP residual add.
    out2 = fused_rmsnorm_swiglu(
        h2, params["mlp_norm_w"], params["Wg"], params["Wu"], params["Wd"], eps
    )
    return out2.reshape(b, s, d)


# ---------------------------------------------------------------------------
# Pure-JAX reference (mirrors the PyTorch module)
# ---------------------------------------------------------------------------
def reference_block(x, params, num_heads, eps=1e-6):
    b, s, d = x.shape
    hd = params["Wk"].shape[1]

    def rmsnorm(t, w):
        return t * jax.lax.rsqrt(jnp.mean(t * t, axis=-1, keepdims=True) + eps) * w

    def rot_half(t):
        half = t.shape[-1] // 2
        return jnp.concatenate([-t[..., half:], t[..., :half]], axis=-1)

    cos_h, sin_h = _rope_cos_sin_half(s, hd)
    cos = jnp.concatenate([cos_h, cos_h], axis=-1)
    sin = jnp.concatenate([sin_h, sin_h], axis=-1)
    cosb = cos[None, :, None, :]
    sinb = sin[None, :, None, :]

    xn = rmsnorm(x, params["attn_norm_w"])
    q = (xn @ params["Wq"]).reshape(b, s, num_heads, hd)
    k = (xn @ params["Wk"]).reshape(b, s, 1, hd)
    v = (xn @ params["Wv"]).reshape(b, s, 1, hd)
    q = q * cosb + rot_half(q) * sinb
    k = k * cosb + rot_half(k) * sinb
    q = q.transpose(0, 2, 1, 3)
    k = jnp.broadcast_to(k.transpose(0, 2, 1, 3), (b, num_heads, s, hd))
    v = jnp.broadcast_to(v.transpose(0, 2, 1, 3), (b, num_heads, s, hd))

    scores = jnp.einsum("bhqd,bhkd->bhqk", q, k) * (1.0 / math.sqrt(hd))
    causal = jnp.triu(jnp.ones((s, s), dtype=bool), k=1)
    scores = jnp.where(causal[None, None], -jnp.inf, scores)
    p = jax.nn.softmax(scores, axis=-1)
    ctx = jnp.einsum("bhqk,bhkd->bhqd", p, v)
    ctx = ctx.transpose(0, 2, 1, 3).reshape(b, s, num_heads * hd)
    h = x + ctx @ params["Wo"]

    hn = rmsnorm(h, params["mlp_norm_w"])
    gate = jax.nn.silu(hn @ params["Wg"])
    up = hn @ params["Wu"]
    return h + (gate * up) @ params["Wd"]


# ---------------------------------------------------------------------------
if __name__ == "__main__":
    key = jax.random.PRNGKey(0)
    batch, seq, dim, num_heads = 2, 8, 128, 4
    head_dim = dim // num_heads
    hidden = 256
    eps = 1e-6

    keys = jax.random.split(key, 8)

    def make_w(k, shape):
        return jax.random.normal(k, shape, jnp.float32) / jnp.sqrt(
            jnp.float32(shape[0])
        )

    ramp = jnp.arange(dim, dtype=jnp.float32) / dim
    params = {
        "attn_norm_w": 1.0 + 0.01 * ramp,
        "Wq": make_w(keys[0], (dim, num_heads * head_dim)),
        "Wk": make_w(keys[1], (dim, head_dim)),
        "Wv": make_w(keys[2], (dim, head_dim)),
        "Wo": make_w(keys[3], (num_heads * head_dim, dim)),
        "mlp_norm_w": 1.0 - 0.01 * ramp,
        "Wg": make_w(keys[4], (dim, hidden)),
        "Wu": make_w(keys[5], (dim, hidden)),
        "Wd": make_w(keys[6], (hidden, dim)),
    }
    params = prepare_params(params)  # one-time QKV weight concat, out of the forward
    x = jax.random.normal(keys[7], (batch, seq, dim), jnp.float32)

    fwd = jax.jit(functools.partial(llama2_block, num_heads=num_heads, eps=eps))
    out = jax.block_until_ready(fwd(x, params))

    ref = reference_block(x, params, num_heads=num_heads, eps=eps)
    assert out.shape == x.shape
    max_err = float(jnp.max(jnp.abs(out - ref)))
    assert jnp.allclose(out, ref, atol=5e-2, rtol=5e-2), (
        f"mismatch vs reference, max abs err {max_err}"
    )

    print("KERNEL_OK")
</pallas_src>

<mosaic_0001>
module attributes {stable_mosaic.version = 11 : i64} {
  func.func @_matmul_residual_kernel(%arg0: i32, %arg1: i32, %arg2: memref<16x128xf32, #tpu.memory_space<vmem>>, %arg3: memref<128x128xf32, #tpu.memory_space<vmem>>, %arg4: memref<16x128xf32, #tpu.memory_space<vmem>>, %arg5: memref<16x128xf32, #tpu.memory_space<vmem>>) attributes {dimension_semantics = [#tpu.dimension_semantics<parallel>, #tpu.dimension_semantics<parallel>], iteration_bounds = array<i64: 1, 1>, scalar_prefetch = 0 : i64, scratch_operands = 0 : i64, tpu.core_type = #tpu.core_type<tc>, window_params = [{transform_indices = @transform_0, window_bounds = array<i64: 16, 128>}, {transform_indices = @transform_1, window_bounds = array<i64: 128, 128>}, {transform_indices = @transform_2, window_bounds = array<i64: 16, 128>}, {transform_indices = @transform_3, window_bounds = array<i64: 16, 128>}]} {
    %c0 = arith.constant 0 : index
    %c0_0 = arith.constant 0 : index
    %0 = vector.load %arg2[%c0, %c0_0] : memref<16x128xf32, #tpu.memory_space<vmem>>, vector<16x128xf32>
    %c0_1 = arith.constant 0 : index
    %c0_2 = arith.constant 0 : index
    %1 = vector.load %arg3[%c0_1, %c0_2] : memref<128x128xf32, #tpu.memory_space<vmem>>, vector<128x128xf32>
    %cst = arith.constant dense<0.000000e+00> : vector<16x128xf32>
    %2 = tpu.matmul %0, %1, %cst {dimension_numbers = #tpu.dot_dimension_numbers<[1], [0], [0], [1], [0, 0, 1, 1], [], []>} : vector<16x128xf32>, vector<128x128xf32>, vector<16x128xf32> -> vector<16x128xf32>
    %c0_3 = arith.constant 0 : index
    %c0_4 = arith.constant 0 : index
    %3 = vector.load %arg4[%c0_3, %c0_4] : memref<16x128xf32, #tpu.memory_space<vmem>>, vector<16x128xf32>
    %4 = arith.addf %3, %2 : vector<16x128xf32>
    %c0_5 = arith.constant 0 : index
    %c0_6 = arith.constant 0 : index
    %5 = vector.load %arg5[%c0_5, %c0_6] : memref<16x128xf32, #tpu.memory_space<vmem>>, vector<16x128xf32>
    tpu.vector_store %arg5[%c0_5, %c0_6], %4 {strides = array<i32>} : memref<16x128xf32, #tpu.memory_space<vmem>>, vector<16x128xf32>,
    return
  }
  func.func @transform_0(%arg0: i32, %arg1: i32) -> (i32, i32) {
    %c0_i32 = arith.constant 0 : i32
    %c0_i32_0 = arith.constant 0 : i32
    return %arg0, %c0_i32 : i32, i32
  }
  func.func @transform_1(%arg0: i32, %arg1: i32) -> (i32, i32) {
    %c0_i32 = arith.constant 0 : i32
    %c0_i32_0 = arith.constant 0 : i32
    return %c0_i32, %arg1 : i32, i32
  }
  func.func @transform_2(%arg0: i32, %arg1: i32) -> (i32, i32) {
    %c0_i32 = arith.constant 0 : i32
    return %arg0, %arg1 : i32, i32
  }
  func.func @transform_3(%arg0: i32, %arg1: i32) -> (i32, i32) {
    %c0_i32 = arith.constant 0 : i32
    return %arg0, %arg1 : i32, i32
  }
}

module attributes {stable_mosaic.version = 11 : i64} {
  func.func @_rmsnorm_matmul_kernel(%arg0: i32, %arg1: i32, %arg2: memref<16x128xf32, #tpu.memory_space<vmem>>, %arg3: memref<1x128xf32, #tpu.memory_space<vmem>>, %arg4: memref<128x192xf32, #tpu.memory_space<vmem>>, %arg5: memref<16x192xf32, #tpu.memory_space<vmem>>, %arg6: memref<16x128xf32, #tpu.memory_space<vmem>>) attributes {dimension_semantics = [#tpu.dimension_semantics<parallel>, #tpu.dimension_semantics<arbitrary>], iteration_bounds = array<i64: 1, 1>, scalar_prefetch = 0 : i64, scratch_operands = 1 : i64, tpu.core_type = #tpu.core_type<tc>, window_params = [{transform_indices = @transform_0, window_bounds = array<i64: 16, 128>}, {pipeline_mode = #tpu.pipeline_mode<synchronous>, transform_indices = @transform_1, window_bounds = array<i64: 1, 128>}, {transform_indices = @transform_2, window_bounds = array<i64: 128, 192>}, {transform_indices = @transform_3, window_bounds = array<i64: 16, 192>}]} {
    %c0_i32 = arith.constant 0 : i32
    %0 = arith.cmpi eq, %arg1, %c0_i32 : i32
    %1 = arith.extui %0 : i1 to i32
    %c0_i32_0 = arith.constant 0 : i32
    %2 = arith.cmpi ne, %1, %c0_i32_0 : i32
    scf.if %2 {
      %c0_6 = arith.constant 0 : index
      %c0_7 = arith.constant 0 : index
      %7 = vector.load %arg2[%c0_6, %c0_7] : memref<16x128xf32, #tpu.memory_space<vmem>>, vector<16x128xf32>
      %8 = arith.mulf %7, %7 : vector<16x128xf32>
      %cst_8 = arith.constant dense<0.000000e+00> : vector<16xf32>
      %9 = vector.multi_reduction <add>, %8, %cst_8 [1] : vector<16x128xf32> to vector<16xf32>
      %10 = vector.shape_cast %9 : vector<16xf32> to vector<16x1xf32>
      %cst_9 = arith.constant 7.812500e-03 : f32
      %11 = vector.broadcast %cst_9 : f32 to vector<16x1xf32>
      %12 = arith.mulf %10, %11 : vector<16x1xf32>
      %cst_10 = arith.constant 9.99999997E-7 : f32
      %13 = vector.broadcast %cst_10 : f32 to vector<16x1xf32>
      %14 = arith.addf %12, %13 : vector<16x1xf32>
      %15 = math.rsqrt %14 : vector<16x1xf32>
      %16 = vector.broadcast %15 : vector<16x1xf32> to vector<16x128xf32>
      %17 = arith.mulf %7, %16 : vector<16x128xf32>
      %c0_11 = arith.constant 0 : index
      %c0_12 = arith.constant 0 : index
      %18 = vector.load %arg3[%c0_11, %c0_12] : memref<1x128xf32, #tpu.memory_space<vmem>>, vector<1x128xf32>
      %19 = vector.broadcast %18 : vector<1x128xf32> to vector<16x128xf32>
      %20 = arith.mulf %17, %19 : vector<16x128xf32>
      %c0_13 = arith.constant 0 : index
      %c0_14 = arith.constant 0 : index
      %21 = vector.load %arg6[%c0_13, %c0_14] : memref<16x128xf32, #tpu.memory_space<vmem>>, vector<16x128xf32>
      tpu.vector_store %arg6[%c0_13, %c0_14], %20 {strides = array<i32>} : memref<16x128xf32, #tpu.memory_space<vmem>>, vector<16x128xf32>,
    } else {
    }
    %c0 = arith.constant 0 : index
    %c0_1 = arith.constant 0 : index
    %3 = vector.load %arg6[%c0, %c0_1] : memref<16x128xf32, #tpu.memory_space<vmem>>, vector<16x128xf32>
    %c0_2 = arith.constant 0 : index
    %c0_3 = arith.constant 0 : index
    %4 = vector.load %arg4[%c0_2, %c0_3] : memref<128x192xf32, #tpu.memory_space<vmem>>, vector<128x192xf32>
    %cst = arith.constant dense<0.000000e+00> : vector<16x192xf32>
    %5 = tpu.matmul %3, %4, %cst {dimension_numbers = #tpu.dot_dimension_numbers<[1], [0], [0], [1], [0, 0, 1, 1], [], []>} : vector<16x128xf32>, vector<128x192xf32>, vector<16x192xf32> -> vector<16x192xf32>
    %c0_4 = arith.constant 0 : index
    %c0_5 = arith.constant 0 : index
    %6 = vector.load %arg5[%c0_4, %c0_5] : memref<16x192xf32, #tpu.memory_space<vmem>>, vector<16x192xf32>
    tpu.vector_store %arg5[%c0_4, %c0_5], %5 {strides = array<i32>} : memref<16x192xf32, #tpu.memory_space<vmem>>, vector<16x192xf32>,
    return
  }
  func.func @transform_0(%arg0: i32, %arg1: i32) -> (i32, i32) {
    %c0_i32 = arith.constant 0 : i32
    %c0_i32_0 = arith.constant 0 : i32
    return %arg0, %c0_i32 : i32, i32
  }
  func.func @transform_1(%arg0: i32, %arg1: i32) -> (i32, i32) {
    %c0_i32 = arith.constant 0 : i32
    %c0_i32_0 = arith.constant 0 : i32
    %c0_i32_1 = arith.constant 0 : i32
    return %c0_i32, %c0_i32_0 : i32, i32
  }
  func.func @transform_2(%arg0: i32, %arg1: i32) -> (i32, i32) {
    %c0_i32 = arith.constant 0 : i32
    %c0_i32_0 = arith.constant 0 : i32
    return %c0_i32, %arg1 : i32, i32
  }
  func.func @transform_3(%arg0: i32, %arg1: i32) -> (i32, i32) {
    %c0_i32 = arith.constant 0 : i32
    return %arg0, %arg1 : i32, i32
  }
}

module attributes {stable_mosaic.version = 11 : i64} {
  func.func @_mqa_attn_kernel(%arg0: i32, %arg1: memref<8x192xf32, #tpu.memory_space<vmem>>, %arg2: memref<8x16xf32, #tpu.memory_space<vmem>>, %arg3: memref<8x16xf32, #tpu.memory_space<vmem>>, %arg4: memref<8x128xf32, #tpu.memory_space<vmem>>) attributes {dimension_semantics = [#tpu.dimension_semantics<parallel>], iteration_bounds = array<i64: 2>, scalar_prefetch = 0 : i64, scratch_operands = 0 : i64, tpu.core_type = #tpu.core_type<tc>, window_params = [{transform_indices = @transform_0, window_bounds = array<i64: 8, 192>}, {pipeline_mode = #tpu.pipeline_mode<synchronous>, transform_indices = @transform_1, window_bounds = array<i64: 8, 16>}, {pipeline_mode = #tpu.pipeline_mode<synchronous>, transform_indices = @transform_2, window_bounds = array<i64: 8, 16>}, {transform_indices = @transform_3, window_bounds = array<i64: 8, 128>}]} {
    %c0 = arith.constant 0 : index
    %c0_0 = arith.constant 0 : index
    %0 = vector.load %arg1[%c0, %c0_0] : memref<8x192xf32, #tpu.memory_space<vmem>>, vector<8x192xf32>
    %c0_1 = arith.constant 0 : index
    %c0_2 = arith.constant 0 : index
    %1 = vector.load %arg2[%c0_1, %c0_2] : memref<8x16xf32, #tpu.memory_space<vmem>>, vector<8x16xf32>
    %c0_3 = arith.constant 0 : index
    %c0_4 = arith.constant 0 : index
    %2 = vector.load %arg3[%c0_3, %c0_4] : memref<8x16xf32, #tpu.memory_space<vmem>>, vector<8x16xf32>
    %3 = vector.extract_strided_slice %0 {offsets = [0, 128], sizes = [8, 16], strides = [1, 1]} : vector<8x192xf32> to vector<8x16xf32>
    %4 = vector.extract_strided_slice %0 {offsets = [0, 144], sizes = [8, 16], strides = [1, 1]} : vector<8x192xf32> to vector<8x16xf32>
    %5 = arith.mulf %3, %1 : vector<8x16xf32>
    %6 = arith.mulf %4, %2 : vector<8x16xf32>
    %7 = arith.subf %5, %6 : vector<8x16xf32>
    %8 = arith.mulf %4, %1 : vector<8x16xf32>
    %9 = arith.mulf %3, %2 : vector<8x16xf32>
    %10 = arith.addf %8, %9 : vector<8x16xf32>
    %11 = vector.extract_strided_slice %0 {offsets = [0, 160], sizes = [8, 32], strides = [1, 1]} : vector<8x192xf32> to vector<8x32xf32>
    %12 = tpu.iota {dimensions = array<i32: 0>} : vector<8x8xi32>
    %13 = tpu.iota {dimensions = array<i32: 1>} : vector<8x8xi32>
    %14 = arith.cmpi sgt, %13, %12 : vector<8x8xi32>
    %cst = arith.constant 0xFF800000 : f32
    %cst_5 = arith.constant 0.000000e+00 : f32
    %15 = vector.broadcast %cst : f32 to vector<8x8xf32>
    %16 = vector.broadcast %cst_5 : f32 to vector<8x8xf32>
    %17 = arith.select %14, %15, %16 : vector<8x8xi1>, vector<8x8xf32>
    %18 = vector.extract_strided_slice %0 {offsets = [0, 0], sizes = [8, 16], strides = [1, 1]} : vector<8x192xf32> to vector<8x16xf32>
    %19 = vector.extract_strided_slice %0 {offsets = [0, 16], sizes = [8, 16], strides = [1, 1]} : vector<8x192xf32> to vector<8x16xf32>
    %20 = arith.mulf %18, %1 : vector<8x16xf32>
    %21 = arith.mulf %19, %2 : vector<8x16xf32>
    %22 = arith.subf %20, %21 : vector<8x16xf32>
    %23 = arith.mulf %19, %1 : vector<8x16xf32>
    %24 = arith.mulf %18, %2 : vector<8x16xf32>
    %25 = arith.addf %23, %24 : vector<8x16xf32>
    %cst_6 = arith.constant dense<0.000000e+00> : vector<8x8xf32>
    %26 = tpu.matmul %22, %7, %cst_6 {dimension_numbers = #tpu.dot_dimension_numbers<[1], [1], [0], [0], [0, 0, 1, 0], [], []>} : vector<8x16xf32>, vector<8x16xf32>, vector<8x8xf32> -> vector<8x8xf32>
    %cst_7 = arith.constant dense<0.000000e+00> : vector<8x8xf32>
    %27 = tpu.matmul %25, %10, %cst_7 {dimension_numbers = #tpu.dot_dimension_numbers<[1], [1], [0], [0], [0, 0, 1, 0], [], []>} : vector<8x16xf32>, vector<8x16xf32>, vector<8x8xf32> -> vector<8x8xf32>
    %28 = arith.addf %26, %27 : vector<8x8xf32>
    %cst_8 = arith.constant 0.176776692 : f32
    %29 = vector.broadcast %cst_8 : f32 to vector<8x8xf32>
    %30 = arith.mulf %28, %29 : vector<8x8xf32>
    %31 = arith.addf %30, %17 : vector<8x8xf32>
    %cst_9 = arith.constant dense<0xFF800000> : vector<8xf32>
    %32 = vector.multi_reduction <maximumf>, %31, %cst_9 [1] : vector<8x8xf32> to vector<8xf32>
    %33 = vector.shape_cast %32 : vector<8xf32> to vector<8x1xf32>
    %34 = vector.broadcast %33 : vector<8x1xf32> to vector<8x8xf32>
    %35 = arith.subf %31, %34 : vector<8x8xf32>
    %36 = math.exp %35 : vector<8x8xf32>
    %cst_10 = arith.constant dense<0.000000e+00> : vector<8xf32>
    %37 = vector.multi_reduction <add>, %36, %cst_10 [1] : vector<8x8xf32> to vector<8xf32>
    %38 = vector.shape_cast %37 : vector<8xf32> to vector<8x1xf32>
    %39 = tpu.reciprocal %38 {approx = true} : vector<8x1xf32> -> vector<8x1xf32>
    %40 = vector.broadcast %39 : vector<8x1xf32> to vector<8x8xf32>
    %41 = arith.mulf %36, %40 : vector<8x8xf32>
    %cst_11 = arith.constant dense<0.000000e+00> : vector<8x32xf32>
    %42 = tpu.matmul %41, %11, %cst_11 {dimension_numbers = #tpu.dot_dimension_numbers<[1], [0], [0], [1], [0, 0, 1, 1], [], []>} : vector<8x8xf32>, vector<8x32xf32>, vector<8x32xf32> -> vector<8x32xf32>
    %c0_12 = arith.constant 0 : index
    %c0_13 = arith.constant 0 : index
    %43 = vector.load %arg4[%c0_12, %c0_13] : memref<8x128xf32, #tpu.memory_space<vmem>>, vector<8x32xf32>
    tpu.vector_store %arg4[%c0_12, %c0_13], %42 {strides = array<i32>} : memref<8x128xf32, #tpu.memory_space<vmem>>, vector<8x32xf32>,
    %44 = vector.extract_strided_slice %0 {offsets = [0, 32], sizes = [8, 16], strides = [1, 1]} : vector<8x192xf32> to vector<8x16xf32>
    %45 = vector.extract_strided_slice %0 {offsets = [0, 48], sizes = [8, 16], strides = [1, 1]} : vector<8x192xf32> to vector<8x16xf32>
    %46 = arith.mulf %44, %1 : vector<8x16xf32>
    %47 = arith.mulf %45, %2 : vector<8x16xf32>
    %48 = arith.subf %46, %47 : vector<8x16xf32>
    %49 = arith.mulf %45, %1 : vector<8x16xf32>
    %50 = arith.mulf %44, %2 : vector<8x16xf32>
    %51 = arith.addf %49, %50 : vector<8x16xf32>
    %cst_14 = arith.constant dense<0.000000e+00> : vector<8x8xf32>
    %52 = tpu.matmul %48, %7, %cst_14 {dimension_numbers = #tpu.dot_dimension_numbers<[1], [1], [0], [0], [0, 0, 1, 0], [], []>} : vector<8x16xf32>, vector<8x16xf32>, vector<8x8xf32> -> vector<8x8xf32>
    %cst_15 = arith.constant dense<0.000000e+00> : vector<8x8xf32>
    %53 = tpu.matmul %51, %10, %cst_15 {dimension_numbers = #tpu.dot_dimension_numbers<[1], [1], [0], [0], [0, 0, 1, 0], [], []>} : vector<8x16xf32>, vector<8x16xf32>, vector<8x8xf32> -> vector<8x8xf32>
    %54 = arith.addf %52, %53 : vector<8x8xf32>
    %cst_16 = arith.constant 0.176776692 : f32
    %55 = vector.broadcast %cst_16 : f32 to vector<8x8xf32>
    %56 = arith.mulf %54, %55 : vector<8x8xf32>
    %57 = arith.addf %56, %17 : vector<8x8xf32>
    %cst_17 = arith.constant dense<0xFF800000> : vector<8xf32>
    %58 = vector.multi_reduction <maximumf>, %57, %cst_17 [1] : vector<8x8xf32> to vector<8xf32>
    %59 = vector.shape_cast %58 : vector<8xf32> to vector<8x1xf32>
    %60 = vector.broadcast %59 : vector<8x1xf32> to vector<8x8xf32>
    %61 = arith.subf %57, %60 : vector<8x8xf32>
    %62 = math.exp %61 : vector<8x8xf32>
    %cst_18 = arith.constant dense<0.000000e+00> : vector<8xf32>
    %63 = vector.multi_reduction <add>, %62, %cst_18 [1] : vector<8x8xf32> to vector<8xf32>
    %64 = vector.shape_cast %63 : vector<8xf32> to vector<8x1xf32>
    %65 = tpu.reciprocal %64 {approx = true} : vector<8x1xf32> -> vector<8x1xf32>
    %66 = vector.broadcast %65 : vector<8x1xf32> to vector<8x8xf32>
    %67 = arith.mulf %62, %66 : vector<8x8xf32>
    %cst_19 = arith.constant dense<0.000000e+00> : vector<8x32xf32>
    %68 = tpu.matmul %67, %11, %cst_19 {dimension_numbers = #tpu.dot_dimension_numbers<[1], [0], [0], [1], [0, 0, 1, 1], [], []>} : vector<8x8xf32>, vector<8x32xf32>, vector<8x32xf32> -> vector<8x32xf32>
    %c0_20 = arith.constant 0 : index
    %c32 = arith.constant 32 : index
    %69 = vector.load %arg4[%c0_20, %c32] : memref<8x128xf32, #tpu.memory_space<vmem>>, vector<8x32xf32>
    tpu.vector_store %arg4[%c0_20, %c32], %68 {strides = array<i32>} : memref<8x128xf32, #tpu.memory_space<vmem>>, vector<8x32xf32>,
    %70 = vector.extract_strided_slice %0 {offsets = [0, 64], sizes = [8, 16], strides = [1, 1]} : vector<8x192xf32> to vector<8x16xf32>
    %71 = vector.extract_strided_slice %0 {offsets = [0, 80], sizes = [8, 16], strides = [1, 1]} : vector<8x192xf32> to vector<8x16xf32>
    %72 = arith.mulf %70, %1 : vector<8x16xf32>
    %73 = arith.mulf %71, %2 : vector<8x16xf32>
    %74 = arith.subf %72, %73 : vector<8x16xf32>
    %75 = arith.mulf %71, %1 : vector<8x16xf32>
    %76 = arith.mulf %70, %2 : vector<8x16xf32>
    %77 = arith.addf %75, %76 : vector<8x16xf32>
    %cst_21 = arith.constant dense<0.000000e+00> : vector<8x8xf32>
    %78 = tpu.matmul %74, %7, %cst_21 {dimension_numbers = #tpu.dot_dimension_numbers<[1], [1], [0], [0], [0, 0, 1, 0], [], []>} : vector<8x16xf32>, vector<8x16xf32>, vector<8x8xf32> -> vector<8x8xf32>
    %cst_22 = arith.constant dense<0.000000e+00> : vector<8x8xf32>
    %79 = tpu.matmul %77, %10, %cst_22 {dimension_numbers = #tpu.dot_dimension_numbers<[1], [1], [0], [0], [0, 0, 1, 0], [], []>} : vector<8x16xf32>, vector<8x16xf32>, vector<8x8xf32> -> vector<8x8xf32>
    %80 = arith.addf %78, %79 : vector<8x8xf32>
    %cst_23 = arith.constant 0.176776692 : f32
    %81 = vector.broadcast %cst_23 : f32 to vector<8x8xf32>
    %82 = arith.mulf %80, %81 : vector<8x8xf32>
    %83 = arith.addf %82, %17 : vector<8x8xf32>
    %cst_24 = arith.constant dense<0xFF800000> : vector<8xf32>
    %84 = vector.multi_reduction <maximumf>, %83, %cst_24 [1] : vector<8x8xf32> to vector<8xf32>
    %85 = vector.shape_cast %84 : vector<8xf32> to vector<8x1xf32>
    %86 = vector.broadcast %85 : vector<8x1xf32> to vector<8x8xf32>
    %87 = arith.subf %83, %86 : vector<8x8xf32>
    %88 = math.exp %87 : vector<8x8xf32>
    %cst_25 = arith.constant dense<0.000000e+00> : vector<8xf32>
    %89 = vector.multi_reduction <add>, %88, %cst_25 [1] : vector<8x8xf32> to vector<8xf32>
    %90 = vector.shape_cast %89 : vector<8xf32> to vector<8x1xf32>
    %91 = tpu.reciprocal %90 {approx = true} : vector<8x1xf32> -> vector<8x1xf32>
    %92 = vector.broadcast %91 : vector<8x1xf32> to vector<8x8xf32>
    %93 = arith.mulf %88, %92 : vector<8x8xf32>
    %cst_26 = arith.constant dense<0.000000e+00> : vector<8x32xf32>
    %94 = tpu.matmul %93, %11, %cst_26 {dimension_numbers = #tpu.dot_dimension_numbers<[1], [0], [0], [1], [0, 0, 1, 1], [], []>} : vector<8x8xf32>, vector<8x32xf32>, vector<8x32xf32> -> vector<8x32xf32>
    %c0_27 = arith.constant 0 : index
    %c64 = arith.constant 64 : index
    %95 = vector.load %arg4[%c0_27, %c64] : memref<8x128xf32, #tpu.memory_space<vmem>>, vector<8x32xf32>
    tpu.vector_store %arg4[%c0_27, %c64], %94 {strides = array<i32>} : memref<8x128xf32, #tpu.memory_space<vmem>>, vector<8x32xf32>,
    %96 = vector.extract_strided_slice %0 {offsets = [0, 96], sizes = [8, 16], strides = [1, 1]} : vector<8x192xf32> to vector<8x16xf32>
    %97 = vector.extract_strided_slice %0 {offsets = [0, 112], sizes = [8, 16], strides = [1, 1]} : vector<8x192xf32> to vector<8x16xf32>
    %98 = arith.mulf %96, %1 : vector<8x16xf32>
    %99 = arith.mulf %97, %2 : vector<8x16xf32>
    %100 = arith.subf %98, %99 : vector<8x16xf32>
    %101 = arith.mulf %97, %1 : vector<8x16xf32>
    %102 = arith.mulf %96, %2 : vector<8x16xf32>
    %103 = arith.addf %101, %102 : vector<8x16xf32>
    %cst_28 = arith.constant dense<0.000000e+00> : vector<8x8xf32>
    %104 = tpu.matmul %100, %7, %cst_28 {dimension_numbers = #tpu.dot_dimension_numbers<[1], [1], [0], [0], [0, 0, 1, 0], [], []>} : vector<8x16xf32>, vector<8x16xf32>, vector<8x8xf32> -> vector<8x8xf32>
    %cst_29 = arith.constant dense<0.000000e+00> : vector<8x8xf32>
    %105 = tpu.matmul %103, %10, %cst_29 {dimension_numbers = #tpu.dot_dimension_numbers<[1], [1], [0], [0], [0, 0, 1, 0], [], []>} : vector<8x16xf32>, vector<8x16xf32>, vector<8x8xf32> -> vector<8x8xf32>
    %106 = arith.addf %104, %105 : vector<8x8xf32>
    %cst_30 = arith.constant 0.176776692 : f32
    %107 = vector.broadcast %cst_30 : f32 to vector<8x8xf32>
    %108 = arith.mulf %106, %107 : vector<8x8xf32>
    %109 = arith.addf %108, %17 : vector<8x8xf32>
    %cst_31 = arith.constant dense<0xFF800000> : vector<8xf32>
    %110 = vector.multi_reduction <maximumf>, %109, %cst_31 [1] : vector<8x8xf32> to vector<8xf32>
    %111 = vector.shape_cast %110 : vector<8xf32> to vector<8x1xf32>
    %112 = vector.broadcast %111 : vector<8x1xf32> to vector<8x8xf32>
    %113 = arith.subf %109, %112 : vector<8x8xf32>
    %114 = math.exp %113 : vector<8x8xf32>
    %cst_32 = arith.constant dense<0.000000e+00> : vector<8xf32>
    %115 = vector.multi_reduction <add>, %114, %cst_32 [1] : vector<8x8xf32> to vector<8xf32>
    %116 = vector.shape_cast %115 : vector<8xf32> to vector<8x1xf32>
    %117 = tpu.reciprocal %116 {approx = true} : vector<8x1xf32> -> vector<8x1xf32>
    %118 = vector.broadcast %117 : vector<8x1xf32> to vector<8x8xf32>
    %119 = arith.mulf %114, %118 : vector<8x8xf32>
    %cst_33 = arith.constant dense<0.000000e+00> : vector<8x32xf32>
    %120 = tpu.matmul %119, %11, %cst_33 {dimension_numbers = #tpu.dot_dimension_numbers<[1], [0], [0], [1], [0, 0, 1, 1], [], []>} : vector<8x8xf32>, vector<8x32xf32>, vector<8x32xf32> -> vector<8x32xf32>
    %c0_34 = arith.constant 0 : index
    %c96 = arith.constant 96 : index
    %121 = vector.load %arg4[%c0_34, %c96] : memref<8x128xf32, #tpu.memory_space<vmem>>, vector<8x32xf32>
    tpu.vector_store %arg4[%c0_34, %c96], %120 {strides = array<i32>} : memref<8x128xf32, #tpu.memory_space<vmem>>, vector<8x32xf32>,
    return
  }
  func.func @transform_0(%arg0: i32) -> (i32, i32) {
    %c0_i32 = arith.constant 0 : i32
    %c0_i32_0 = arith.constant 0 : i32
    return %arg0, %c0_i32 : i32, i32
  }
  func.func @transform_1(%arg0: i32) -> (i32, i32) {
    %c0_i32 = arith.constant 0 : i32
    %c0_i32_0 = arith.constant 0 : i32
    %c0_i32_1 = arith.constant 0 : i32
    return %c0_i32, %c0_i32_0 : i32, i32
  }
  func.func @transform_2(%arg0: i32) -> (i32, i32) {
    %c0_i32 = arith.constant 0 : i32
    %c0_i32_0 = arith.constant 0 : i32
    %c0_i32_1 = arith.constant 0 : i32
    return %c0_i32, %c0_i32_0 : i32, i32
  }
  func.func @transform_3(%arg0: i32) -> (i32, i32) {
    %c0_i32 = arith.constant 0 : i32
    %c0_i32_0 = arith.constant 0 : i32
    return %arg0, %c0_i32 : i32, i32
  }
}

module attributes {stable_mosaic.version = 11 : i64} {
  func.func @_rmsnorm_swiglu_kernel(%arg0: i32, %arg1: i32, %arg2: memref<16x128xf32, #tpu.memory_space<vmem>>, %arg3: memref<1x128xf32, #tpu.memory_space<vmem>>, %arg4: memref<128x256xf32, #tpu.memory_space<vmem>>, %arg5: memref<128x256xf32, #tpu.memory_space<vmem>>, %arg6: memref<256x128xf32, #tpu.memory_space<vmem>>, %arg7: memref<16x128xf32, #tpu.memory_space<vmem>>, %arg8: memref<16x128xf32, #tpu.memory_space<vmem>>, %arg9: memref<16x128xf32, #tpu.memory_space<vmem>>) attributes {dimension_semantics = [#tpu.dimension_semantics<parallel>, #tpu.dimension_semantics<arbitrary>], iteration_bounds = array<i64: 1, 1>, scalar_prefetch = 0 : i64, scratch_operands = 2 : i64, tpu.core_type = #tpu.core_type<tc>, window_params = [{transform_indices = @transform_0, window_bounds = array<i64: 16, 128>}, {pipeline_mode = #tpu.pipeline_mode<synchronous>, transform_indices = @transform_1, window_bounds = array<i64: 1, 128>}, {transform_indices = @transform_2, window_bounds = array<i64: 128, 256>}, {transform_indices = @transform_3, window_bounds = array<i64: 128, 256>}, {transform_indices = @transform_4, window_bounds = array<i64: 256, 128>}, {transform_indices = @transform_5, window_bounds = array<i64: 16, 128>}]} {
    %c0_i32 = arith.constant 0 : i32
    %0 = arith.cmpi eq, %arg1, %c0_i32 : i32
    %1 = arith.extui %0 : i1 to i32
    %c0_i32_0 = arith.constant 0 : i32
    %2 = arith.cmpi ne, %1, %c0_i32_0 : i32
    scf.if %2 {
      %c0_19 = arith.constant 0 : index
      %c0_20 = arith.constant 0 : index
      %25 = vector.load %arg2[%c0_19, %c0_20] : memref<16x128xf32, #tpu.memory_space<vmem>>, vector<16x128xf32>
      %c0_21 = arith.constant 0 : index
      %c0_22 = arith.constant 0 : index
      %26 = vector.load %arg9[%c0_21, %c0_22] : memref<16x128xf32, #tpu.memory_space<vmem>>, vector<16x128xf32>
      tpu.vector_store %arg9[%c0_21, %c0_22], %25 {strides = array<i32>} : memref<16x128xf32, #tpu.memory_space<vmem>>, vector<16x128xf32>,
      %27 = arith.mulf %25, %25 : vector<16x128xf32>
      %cst_23 = arith.constant dense<0.000000e+00> : vector<16xf32>
      %28 = vector.multi_reduction <add>, %27, %cst_23 [1] : vector<16x128xf32> to vector<16xf32>
      %29 = vector.shape_cast %28 : vector<16xf32> to vector<16x1xf32>
      %cst_24 = arith.constant 7.812500e-03 : f32
      %30 = vector.broadcast %cst_24 : f32 to vector<16x1xf32>
      %31 = arith.mulf %29, %30 : vector<16x1xf32>
      %cst_25 = arith.constant 9.99999997E-7 : f32
      %32 = vector.broadcast %cst_25 : f32 to vector<16x1xf32>
      %33 = arith.addf %31, %32 : vector<16x1xf32>
      %34 = math.rsqrt %33 : vector<16x1xf32>
      %35 = vector.broadcast %34 : vector<16x1xf32> to vector<16x128xf32>
      %36 = arith.mulf %25, %35 : vector<16x128xf32>
      %c0_26 = arith.constant 0 : index
      %c0_27 = arith.constant 0 : index
      %37 = vector.load %arg3[%c0_26, %c0_27] : memref<1x128xf32, #tpu.memory_space<vmem>>, vector<1x128xf32>
      %38 = vector.broadcast %37 : vector<1x128xf32> to vector<16x128xf32>
      %39 = arith.mulf %36, %38 : vector<16x128xf32>
      %c0_28 = arith.constant 0 : index
      %c0_29 = arith.constant 0 : index
      %40 = vector.load %arg8[%c0_28, %c0_29] : memref<16x128xf32, #tpu.memory_space<vmem>>, vector<16x128xf32>
      tpu.vector_store %arg8[%c0_28, %c0_29], %39 {strides = array<i32>} : memref<16x128xf32, #tpu.memory_space<vmem>>, vector<16x128xf32>,
    } else {
    }
    %c0 = arith.constant 0 : index
    %c0_1 = arith.constant 0 : index
    %3 = vector.load %arg8[%c0, %c0_1] : memref<16x128xf32, #tpu.memory_space<vmem>>, vector<16x128xf32>
    %c0_2 = arith.constant 0 : index
    %c0_3 = arith.constant 0 : index
    %4 = vector.load %arg4[%c0_2, %c0_3] : memref<128x256xf32, #tpu.memory_space<vmem>>, vector<128x256xf32>
    %cst = arith.constant dense<0.000000e+00> : vector<16x256xf32>
    %5 = tpu.matmul %3, %4, %cst {dimension_numbers = #tpu.dot_dimension_numbers<[1], [0], [0], [1], [0, 0, 1, 1], [], []>} : vector<16x128xf32>, vector<128x256xf32>, vector<16x256xf32> -> vector<16x256xf32>
    %c0_4 = arith.constant 0 : index
    %c0_5 = arith.constant 0 : index
    %6 = vector.load %arg5[%c0_4, %c0_5] : memref<128x256xf32, #tpu.memory_space<vmem>>, vector<128x256xf32>
    %cst_6 = arith.constant dense<0.000000e+00> : vector<16x256xf32>
    %7 = tpu.matmul %3, %6, %cst_6 {dimension_numbers = #tpu.dot_dimension_numbers<[1], [0], [0], [1], [0, 0, 1, 1], [], []>} : vector<16x128xf32>, vector<128x256xf32>, vector<16x256xf32> -> vector<16x256xf32>
    %cst_7 = arith.constant 0.000000e+00 : f32
    %8 = vector.broadcast %cst_7 : f32 to vector<16x256xf32>
    %9 = arith.subf %8, %5 : vector<16x256xf32>
    %10 = math.exp %9 : vector<16x256xf32>
    %cst_8 = arith.constant 1.000000e+00 : f32
    %11 = vector.broadcast %cst_8 : f32 to vector<16x256xf32>
    %12 = arith.addf %11, %10 : vector<16x256xf32>
    %cst_9 = arith.constant 1.000000e+00 : f32
    %13 = vector.broadcast %cst_9 : f32 to vector<16x256xf32>
    %14 = arith.divf %13, %12 : vector<16x256xf32>
    %15 = arith.mulf %5, %14 : vector<16x256xf32>
    %16 = arith.mulf %15, %7 : vector<16x256xf32>
    %c0_10 = arith.constant 0 : index
    %c0_11 = arith.constant 0 : index
    %17 = vector.load %arg9[%c0_10, %c0_11] : memref<16x128xf32, #tpu.memory_space<vmem>>, vector<16x128xf32>
    %c0_12 = arith.constant 0 : index
    %c0_13 = arith.constant 0 : index
    %18 = vector.load %arg6[%c0_12, %c0_13] : memref<256x128xf32, #tpu.memory_space<vmem>>, vector<256x128xf32>
    %cst_14 = arith.constant dense<0.000000e+00> : vector<16x128xf32>
    %19 = tpu.matmul %16, %18, %cst_14 {dimension_numbers = #tpu.dot_dimension_numbers<[1], [0], [0], [1], [0, 0, 1, 1], [], []>} : vector<16x256xf32>, vector<256x128xf32>, vector<16x128xf32> -> vector<16x128xf32>
    %20 = arith.addf %17, %19 : vector<16x128xf32>
    %c0_15 = arith.constant 0 : index
    %c0_16 = arith.constant 0 : index
    %21 = vector.load %arg9[%c0_15, %c0_16] : memref<16x128xf32, #tpu.memory_space<vmem>>, vector<16x128xf32>
    tpu.vector_store %arg9[%c0_15, %c0_16], %20 {strides = array<i32>} : memref<16x128xf32, #tpu.memory_space<vmem>>, vector<16x128xf32>,
    %c0_i32_17 = arith.constant 0 : i32
    %22 = arith.cmpi eq, %arg1, %c0_i32_17 : i32
    %23 = arith.extui %22 : i1 to i32
    %c0_i32_18 = arith.constant 0 : i32
    %24 = arith.cmpi ne, %23, %c0_i32_18 : i32
    scf.if %24 {
      %c0_19 = arith.constant 0 : index
      %c0_20 = arith.constant 0 : index
      %25 = vector.load %arg9[%c0_19, %c0_20] : memref<16x128xf32, #tpu.memory_space<vmem>>, vector<16x128xf32>
      %c0_21 = arith.constant 0 : index
      %c0_22 = arith.constant 0 : index
      %26 = vector.load %arg7[%c0_21, %c0_22] : memref<16x128xf32, #tpu.memory_space<vmem>>, vector<16x128xf32>
      tpu.vector_store %arg7[%c0_21, %c0_22], %25 {strides = array<i32>} : memref<16x128xf32, #tpu.memory_space<vmem>>, vector<16x128xf32>,
    } else {
    }
    return
  }
  func.func @transform_0(%arg0: i32, %arg1: i32) -> (i32, i32) {
    %c0_i32 = arith.constant 0 : i32
    %c0_i32_0 = arith.constant 0 : i32
    return %arg0, %c0_i32 : i32, i32
  }
  func.func @transform_1(%arg0: i32, %arg1: i32) -> (i32, i32) {
    %c0_i32 = arith.constant 0 : i32
    %c0_i32_0 = arith.constant 0 : i32
    %c0_i32_1 = arith.constant 0 : i32
    return %c0_i32, %c0_i32_0 : i32, i32
  }
  func.func @transform_2(%arg0: i32, %arg1: i32) -> (i32, i32) {
    %c0_i32 = arith.constant 0 : i32
    %c0_i32_0 = arith.constant 0 : i32
    return %c0_i32, %arg1 : i32, i32
  }
  func.func @transform_3(%arg0: i32, %arg1: i32) -> (i32, i32) {
    %c0_i32 = arith.constant 0 : i32
    %c0_i32_0 = arith.constant 0 : i32
    return %c0_i32, %arg1 : i32, i32
  }
  func.func @transform_4(%arg0: i32, %arg1: i32) -> (i32, i32) {
    %c0_i32 = arith.constant 0 : i32
    %c0_i32_0 = arith.constant 0 : i32
    return %arg1, %c0_i32 : i32, i32
  }
  func.func @transform_5(%arg0: i32, %arg1: i32) -> (i32, i32) {
    %c0_i32 = arith.constant 0 : i32
    %c0_i32_0 = arith.constant 0 : i32
    return %arg0, %c0_i32 : i32, i32
  }
}

</mosaic_0001>

<bundles_post_ra>
// kernel: llama2_block.6
= control target key start
LH: loop header
LB: loop body
LE: loop exit
PB: predicated region body
PF: predicated region fallthrough
CT: control target
= control target key end

     0   :  { %s167_s1 = inlined_call_operand.vmem [shape: f32[128,128], index: 1, kind: input, shape index: {}]   ;;  %s168_s0 = inlined_call_operand.vmem [shape: f32[16,128], index: 0, kind: input, shape index: {}]   ;;  %s169_s2 = inlined_call_operand.vmem [shape: f32[16,128], index: 2, kind: input, shape index: {}]   ;;  %s170_s3 = inlined_call_operand.vmem [shape: f32[16,128], index: 3, kind: output, shape index: {}]  }
   0x1   :  { %v31_v0 = vld [vmem:[%s167_s1 + $0x78] sm:$0xff]  ;;  %v30_v1 = vld [vmem:[%s167_s1 + $0x70] sm:$0xff]  ;;  %v29_v2 = vld [vmem:[%s167_s1 + $0x68] sm:$0xff] }
   0x2   :  { %32 = vmatpush.msra.mxu0 %v31_v0  ;;  %65 = vmatpush.msra.mxu1 %v31_v0  ;;  %v28_v3 = vld [vmem:[%s167_s1 + $0x60] sm:$0xff]  ;;  %v27_v4 = vld [vmem:[%s167_s1 + $0x58] sm:$0xff]  ;;  %v26_v5 = vld [vmem:[%s167_s1 + $0x50] sm:$0xff] }
   0x3   :  { %v25_v6 = vld [vmem:[%s167_s1 + $0x48] sm:$0xff]  ;;  %v24_v7 = vld [vmem:[%s167_s1 + $0x40] sm:$0xff]  ;;  %v23_v8 = vld [vmem:[%s167_s1 + $0x38] sm:$0xff] }
   0x4   :  { %33 = vmatpush.msra.mxu0 %v30_v1  ;;  %66 = vmatpush.msra.mxu1 %v30_v1  ;;  %v22_v9 = vld [vmem:[%s167_s1 + $0x30] sm:$0xff]  ;;  %v21_v10 = vld [vmem:[%s167_s1 + $0x28] sm:$0xff]  ;;  %v20_v11 = vld [vmem:[%s167_s1 + $0x20] sm:$0xff] }
   0x5   :  { %v19_v12 = vld [vmem:[%s167_s1 + $0x18] sm:$0xff]  ;;  %v18_v13 = vld [vmem:[%s167_s1 + $0x10] sm:$0xff]  ;;  %v17_v14 = vld [vmem:[%s167_s1 + $0x8] sm:$0xff] }
   0x6   :  { %34 = vmatpush.msra.mxu0 %v29_v2  ;;  %67 = vmatpush.msra.mxu1 %v29_v2  ;;  %v16_v15 = vld [vmem:[%s167_s1] sm:$0xff]  ;;  %v15_v17 = vld [vmem:[%s168_s0 + $0x8] sm:$0xff] }
   0x7   :  { %v14_v16 = vld [vmem:[%s168_s0] sm:$0xff]  ;;  %v56_v19 = vld [vmem:[%s169_s2 + $0x8] sm:$0xff] }
   0x8   :  { %35 = vmatpush.msra.mxu0 %v28_v3  ;;  %68 = vmatpush.msra.mxu1 %v28_v3  ;;  %v55_v18 = vld [vmem:[%s169_s2] sm:$0xff] }
   0xa   :  { %36 = vmatpush.msra.mxu0 %v27_v4  ;;  %69 = vmatpush.msra.mxu1 %v27_v4 }
   0xc   :  { %37 = vmatpush.msra.mxu0 %v26_v5  ;;  %70 = vmatpush.msra.mxu1 %v26_v5 }
   0xe   :  { %38 = vmatpush.msra.mxu0 %v25_v6  ;;  %71 = vmatpush.msra.mxu1 %v25_v6 }
  0x10   :  { %39 = vmatpush.msra.mxu0 %v24_v7  ;;  %72 = vmatpush.msra.mxu1 %v24_v7 }
  0x12   :  { %40 = vmatpush.msra.mxu0 %v23_v8  ;;  %73 = vmatpush.msra.mxu1 %v23_v8 }
  0x14   :  { %41 = vmatpush.msra.mxu0 %v22_v9  ;;  %74 = vmatpush.msra.mxu1 %v22_v9 }
  0x16   :  { %42 = vmatpush.msra.mxu0 %v21_v10  ;;  %75 = vmatpush.msra.mxu1 %v21_v10 }
  0x18   :  { %43 = vmatpush.msra.mxu0 %v20_v11  ;;  %76 = vmatpush.msra.mxu1 %v20_v11 }
  0x1a   :  { %44 = vmatpush.msra.mxu0 %v19_v12  ;;  %77 = vmatpush.msra.mxu1 %v19_v12 }
  0x1c   :  { %45 = vmatpush.msra.mxu0 %v18_v13  ;;  %78 = vmatpush.msra.mxu1 %v18_v13 }
  0x1e   :  { %46 = vmatpush.msra.mxu0 %v17_v14  ;;  %79 = vmatpush.msra.mxu1 %v17_v14 }
  0x20   :  { %47 = vmatpush.msra.mxu0 %v16_v15  ;;  %80 = vmatpush.msra.mxu1 %v16_v15 }
  0x21   :  { %48 = vmatmul.f32.vlgmr.msra.gmra.mxu0 %v14_v16  ;;  %51 = vmatmul.f32.vlgmr.msra.gmra.mxu1 %v15_v17 }
  0x9e   :  { %v49_v20 = vpop.f32.mrf.mxu0  ;;  %v52_v21 = vpop.f32.mrf.mxu1 }
  0x9f   :  { %v57_v22 = vadd.f32 %v55_v18, %v49_v20  ;;  %v58_v23 = vadd.f32 %v56_v19, %v52_v21 }
  0xa1   :  { %59 = vst [vmem:[%s170_s3] sm:$0xff] %v57_v22 }
  0xa2   :  { %60 = vst [vmem:[%s170_s3 + $0x8] sm:$0xff] %v58_v23 }

// kernel: llama2_block.4
= control target key start
LH: loop header
LB: loop body
LE: loop exit
PB: predicated region body
PF: predicated region fallthrough
CT: control target
= control target key end

     0   :  { %vm141_vm6 = vcmask 523264   ;;  %s333_s0 = inlined_call_operand.vmem [shape: f32[16,128], index: 0, kind: input, shape index: {}]   ;;  %s334_s2 = inlined_call_operand.vmem [shape: f32[128,192], index: 2, kind: input, shape index: {}]   ;;  %s335_s1 = inlined_call_operand.vmem [shape: f32[1,128], index: 1, kind: input, shape index: {}]   ;;  %s336_s3 = inlined_call_operand.vmem [shape: f32[16,192], index: 3, kind: output, shape index: {}]  }
   0x1   :  { %v209_v0 = vld [vmem:[%s333_s0 + $0x8] sm:$0xff]  ;;  %v92_v1 = vld [vmem:[%s334_s2 + $0xf0] sm:$0xff]  ;;  %v93_v3 = vld [vmem:[%s334_s2 + $0xf8] sm:$0xff] }
   0x2   :  { %v21_v2 = vmul.f32 %v209_v0, %v209_v0  ;;  %149 = vmatpush.msra.mxu2 %v92_v1  ;;  %v90_v4 = vld [vmem:[%s334_s2 + $0xe0] sm:$0xff]  ;;  %v91_v5 = vld [vmem:[%s334_s2 + $0xe8] sm:$0xff]  ;;  %94 = vmatpush.msra.mxu0 %v92_v1  ;;  %v88_v6 = vld [vmem:[%s334_s2 + $0xd0] sm:$0xff] }
   0x3   :  { %165 = vmatpush.msra.mxu3 %v93_v3  ;;  %117 = vmatpush.msra.mxu1 %v93_v3  ;;  %v89_v7 = vld [vmem:[%s334_s2 + $0xd8] sm:$0xff]  ;;  %v234_v8 = vld [vmem:[%s333_s0] sm:$0xff]  ;;  %v87_v11 = vld [vmem:[%s334_s2 + $0xc8] sm:$0xff] }
   0x4   :  { %24 = vadd.xlane.f32.xlu0 %v21_v2  ;;  %150 = vmatpush.msra.mxu2 %v90_v4  ;;  %v20_v9 = vmul.f32 %v234_v8, %v234_v8  ;;  %v86_v10 = vld [vmem:[%s334_s2 + $0xc0] sm:$0xff]  ;;  %v84_v12 = vld [vmem:[%s334_s2 + $0xb0] sm:$0xff]  ;;  %v85_v13 = vld [vmem:[%s334_s2 + $0xb8] sm:$0xff] }
   0x5   :  { %166 = vmatpush.msra.mxu3 %v91_v5  ;;  %95 = vmatpush.msra.mxu0 %v90_v4  ;;  %v82_v14 = vld [vmem:[%s334_s2 + $0xa0] sm:$0xff]  ;;  %v83_v15 = vld [vmem:[%s334_s2 + $0xa8] sm:$0xff]  ;;  %v80_v16 = vld [vmem:[%s334_s2 + $0x90] sm:$0xff] }
   0x6   :  { %151 = vmatpush.msra.mxu2 %v88_v6  ;;  %118 = vmatpush.msra.mxu1 %v91_v5  ;;  %v81_v17 = vld [vmem:[%s334_s2 + $0x98] sm:$0xff]  ;;  %v78_v18 = vld [vmem:[%s334_s2 + $0x80] sm:$0xff]  ;;  %v79_v19 = vld [vmem:[%s334_s2 + $0x88] sm:$0xff] }
   0x7   :  { %167 = vmatpush.msra.mxu3 %v89_v7  ;;  %96 = vmatpush.msra.mxu0 %v88_v6  ;;  %v76_v20 = vld [vmem:[%s334_s2 + $0x70] sm:$0xff]  ;;  %v77_v21 = vld [vmem:[%s334_s2 + $0x78] sm:$0xff]  ;;  %v74_v22 = vld [vmem:[%s334_s2 + $0x60] sm:$0xff] }
   0x8   :  { %119 = vmatpush.msra.mxu1 %v89_v7  ;;  %152 = vmatpush.msra.mxu2 %v86_v10  ;;  %v75_v23 = vld [vmem:[%s334_s2 + $0x68] sm:$0xff]  ;;  %v72_v24 = vld [vmem:[%s334_s2 + $0x50] sm:$0xff]  ;;  %v73_v25 = vld [vmem:[%s334_s2 + $0x58] sm:$0xff] }
   0x9   :  { %168 = vmatpush.msra.mxu3 %v87_v11  ;;  %97 = vmatpush.msra.mxu0 %v86_v10  ;;  %v70_v26 = vld [vmem:[%s334_s2 + $0x40] sm:$0xff]  ;;  %v71_v27 = vld [vmem:[%s334_s2 + $0x48] sm:$0xff]  ;;  %v68_v28 = vld [vmem:[%s334_s2 + $0x30] sm:$0xff] }
   0xa   :  { %120 = vmatpush.msra.mxu1 %v87_v11  ;;  %153 = vmatpush.msra.mxu2 %v84_v12  ;;  %v69_v29 = vld [vmem:[%s334_s2 + $0x38] sm:$0xff]  ;;  %v66_v30 = vld [vmem:[%s334_s2 + $0x20] sm:$0xff]  ;;  %v67_v31 = vld [vmem:[%s334_s2 + $0x28] sm:$0xff] }
   0xb   :  { %169 = vmatpush.msra.mxu3 %v85_v13  ;;  %98 = vmatpush.msra.mxu0 %v84_v12  ;;  %v64_v32 = vld [vmem:[%s334_s2 + $0x10] sm:$0xff]  ;;  %v65_v33 = vld [vmem:[%s334_s2 + $0x18] sm:$0xff]  ;;  %v62_v34 = vld [vmem:[%s334_s2] sm:$0xff] }
   0xc   :  { %22 = vadd.xlane.f32.xlu0 %v20_v9  ;;  %121 = vmatpush.msra.mxu1 %v85_v13  ;;  %v63_v35 = vld [vmem:[%s334_s2 + $0x8] sm:$0xff]  ;;  %v181_v50 = vld [vmem:[%s335_s1] ss:$0 sm:$0xff] }
   0xd   :  { %154 = vmatpush.msra.mxu2 %v82_v14  ;;  %170 = vmatpush.msra.mxu3 %v83_v15 }
   0xe   :  { %99 = vmatpush.msra.mxu0 %v82_v14  ;;  %122 = vmatpush.msra.mxu1 %v83_v15 }
   0xf   :  { %155 = vmatpush.msra.mxu2 %v80_v16  ;;  %171 = vmatpush.msra.mxu3 %v81_v17 }
  0x10   :  { %100 = vmatpush.msra.mxu0 %v80_v16  ;;  %123 = vmatpush.msra.mxu1 %v81_v17 }
  0x11   :  { %156 = vmatpush.msra.mxu2 %v78_v18  ;;  %172 = vmatpush.msra.mxu3 %v79_v19 }
  0x12   :  { %101 = vmatpush.msra.mxu0 %v78_v18  ;;  %124 = vmatpush.msra.mxu1 %v79_v19 }
  0x13   :  { %157 = vmatpush.msra.mxu2 %v76_v20  ;;  %173 = vmatpush.msra.mxu3 %v77_v21 }
  0x14   :  { %102 = vmatpush.msra.mxu0 %v76_v20  ;;  %125 = vmatpush.msra.mxu1 %v77_v21 }
  0x15   :  { %158 = vmatpush.msra.mxu2 %v74_v22  ;;  %174 = vmatpush.msra.mxu3 %v75_v23 }
  0x16   :  { %103 = vmatpush.msra.mxu0 %v74_v22  ;;  %126 = vmatpush.msra.mxu1 %v75_v23 }
  0x17   :  { %159 = vmatpush.msra.mxu2 %v72_v24  ;;  %175 = vmatpush.msra.mxu3 %v73_v25 }
  0x18   :  { %104 = vmatpush.msra.mxu0 %v72_v24  ;;  %127 = vmatpush.msra.mxu1 %v73_v25 }
  0x19   :  { %160 = vmatpush.msra.mxu2 %v70_v26  ;;  %176 = vmatpush.msra.mxu3 %v71_v27 }
  0x1a   :  { %105 = vmatpush.msra.mxu0 %v70_v26  ;;  %128 = vmatpush.msra.mxu1 %v71_v27 }
  0x1b   :  { %161 = vmatpush.msra.mxu2 %v68_v28  ;;  %177 = vmatpush.msra.mxu3 %v69_v29 }
  0x1c   :  { %106 = vmatpush.msra.mxu0 %v68_v28  ;;  %129 = vmatpush.msra.mxu1 %v69_v29 }
  0x1d   :  { %162 = vmatpush.msra.mxu2 %v66_v30  ;;  %178 = vmatpush.msra.mxu3 %v67_v31 }
  0x1e   :  { %107 = vmatpush.msra.mxu0 %v66_v30  ;;  %130 = vmatpush.msra.mxu1 %v67_v31 }
  0x1f   :  { %163 = vmatpush.msra.mxu2 %v64_v32  ;;  %179 = vmatpush.msra.mxu3 %v65_v33 }
  0x20   :  { %108 = vmatpush.msra.mxu0 %v64_v32  ;;  %131 = vmatpush.msra.mxu1 %v65_v33 }
  0x21   :  { %164 = vmatpush.msra.mxu2 %v62_v34  ;;  %180 = vmatpush.msra.mxu3 %v63_v35 }
  0x22   :  { %109 = vmatpush.msra.mxu0 %v62_v34  ;;  %132 = vmatpush.msra.mxu1 %v63_v35 }
  0x77   :  { %v25_v36 = vpop.xlane.xlu0 %24 }
  0x78   :  { %v27_v37 = vmul.f32 0.0078125, %v25_v36 }
  0x7a   :  { %v29_v38 = vadd.f32 1e-06, %v27_v37 }
  0x7c   :  { %182 = vrsqrt.f32 %v29_v38  ;;  %vm46_vm1 = vweird.f32 %v29_v38 }
  0x7f   :  { %v23_v39 = vpop.xlane.xlu0 %22 }
  0x80   :  { %v26_v40 = vmul.f32 0.0078125, %v23_v39 }
  0x82   :  { %v183_v41 = vpop.eup %182  ;;  %v28_v42 = vadd.f32 1e-06, %v26_v40 }
  0x83   :  { %v41_v43 = vmul.f32 %v183_v41, %v29_v38  ;;  %vm47_vm0 = vweird.f32 %v183_v41 }
  0x84   :  { %184 = vrsqrt.f32 %v28_v42  ;;  %vm48_vm2 = vmor %vm46_vm1, %vm47_vm0  ;;  %vm36_vm4 = vweird.f32 %v28_v42 }
  0x85   :  { %v42_v44 = vmul.f32 %v183_v41, %v41_v43 }
  0x87   :  { %v43_v45 = vmul.f32 0.5, %v42_v44 }
  0x89   :  { %v44_v46 = vsub.f32 1.5, %v43_v45 }
  0x8a   :  { %v185_v47 = vpop.eup %184 }
  0x8b   :  { %v31_v48 = vmul.f32 %v185_v47, %v28_v42  ;;  %v45_v49 = vmul.f32 %v183_v41, %v44_v46  ;;  %vm37_vm3 = vweird.f32 %v185_v47 }
  0x8c   :  { %vm38_vm5 = vmor %vm36_vm4, %vm37_vm3 }
  0x8d   :  { %v32_v51 = vmul.f32 %v185_v47, %v31_v48  ;;  %v49_v52 = vsel %vm48_vm2, %v183_v41, %v45_v49 }
  0x8e   :  { %v51_v53 = vmul.f32 %v49_v52, %v209_v0 }
  0x8f   :  { %v33_v54 = vmul.f32 0.5, %v32_v51 }
  0x90   :  { %v57_v55 = vmul.f32 %v181_v50, %v51_v53 }
  0x91   :  { %v34_v56 = vsub.f32 1.5, %v33_v54 }
  0x92   :  { %113 = vmatmul.f32.vlgmr.msra.gmra.mxu2 %v57_v55  ;;  %136 = vmatmul.f32.vlgmr.msra.gmra.mxu3 %v57_v55 }
  0x93   :  { %v35_v57 = vmul.f32 %v185_v47, %v34_v56 }
  0x95   :  { %v39_v58 = vsel %vm38_vm5, %v185_v47, %v35_v57 }
  0x96   :  { %v50_v59 = vmul.f32 %v39_v58, %v234_v8 }
  0x98   :  { %v56_v60 = vmul.f32 %v181_v50, %v50_v59 }
  0x9a   :  { %110 = vmatmul.f32.vlgmr.msra.gmra.mxu0 %v56_v60  ;;  %133 = vmatmul.f32.vlgmr.msra.gmra.mxu1 %v56_v60 }
 0x115   :  { %v114_v61 = vpop.f32.mrf.mxu2  ;;  %v137_v62 = vpop.f32.mrf.mxu3 }
 0x116   :  { %143 = vst [vmem:[%s336_s3 + $0x10] sm:$0xff] %v114_v61 }
 0x117   :  { %144 = vst.msk [vmem:[%s336_s3 + $0x18] sm:$0xff] %vm141_vm6, %v137_v62  ;;  %v111_v63 = vpop.f32.mrf.mxu0  ;;  %v134_v0 = vpop.f32.mrf.mxu1 }
 0x118   :  { %140 = vst [vmem:[%s336_s3] sm:$0xff] %v111_v63 }
 0x119   :  { %142 = vst.msk [vmem:[%s336_s3 + $0x8] sm:$0xff] %vm141_vm6, %v134_v0 }

// kernel: llama2_block.5
= control target key start
LH: loop header
LB: loop body
LE: loop exit
PB: predicated region body
PF: predicated region fallthrough
CT: control target
= control target key end

     0   :  { %s821_s12 = smov 0   ;;  %s961_s0 = inlined_call_operand.vmem [shape: f32[16,192], index: 0, kind: input, shape index: {}]   ;;  %s962_s1 = inlined_call_operand.vmem [shape: f32[8,16], index: 1, kind: input, shape index: {}]   ;;  %s963_s2 = inlined_call_operand.vmem [shape: f32[8,16], index: 2, kind: input, shape index: {}]   ;;  %s964_s3 = inlined_call_operand.vmem [shape: f32[16,128], index: 3, kind: output, shape index: {}]  }
   0x1 LB: > { %s722_s13 = sadd.s32 4294967295, %s791_s12   ;;  %p726_p0 = scmp.ge.s32.totalorder %s791_s12, 1  ;;  %s791_s12 = sphi %s821_s12, %s13_s12  }
   0x2   : > { %p137_p1 = scmp.lt.s32.totalorder %s791_s12, 3 }
   0x4   : > { %p138_p2 = pnand %p726_p0, %p137_p1 }
   0x5   : > { %p160_p3 = scmp.lt.s32.totalorder (!%p138_p2), %s722_s13, 1  ;;  %s793_s16 = smov (!%p138_p2), 16  }
   0x6   : > { %141 = sbr.rel (%p138_p2) target bundleno = 1685 (0x695), region = 32  ;;  %s794_s23 = smov (!%p138_p2), 112  }
   0x7   : > { %s795_s24 = smov (!%p138_p2), 32   ;;  %s796_s25 = smov (!%p138_p2), 48  }
   0x8   : > { %s797_s26 = smov (!%p138_p2), 96   ;;  %s799_s27 = smov (!%p138_p2), 80  }
   0x9   : > { %s800_s28 = smov (!%p138_p2), 64  }
   0xb   : > { %v832_v0 = vld [vmem:[%s963_s2] sm:$0xff]  ;;  %s966_s13 = smov (!%p160_p3, %s722_s13), 1  ;;  %vm221_vm0 = vcmask 130048   ;;  %v195_v31 = vlaneseq  ;;  %v798_v38 = vmov 0.0   ;;  %vm274_vm2 = vcmask 64512  }
   0xc   : > { %175 = vrot.lane.b32.xlu0 %v832_v0, %s793_s16  ;;  %s752_s17 = sshll.u32 %s966_s13, 4  ;;  %v845_v1 = vld [vmem:[%s962_s1] sm:$0xff]  ;;  %s729_s29 = sshll.u32 %s966_s13, 3  ;;  %vm313_vm3 = vcmask 261120   ;;  %vm431_vm4 = vcmask 523520   ;;  %vm549_vm5 = vcmask 785920  }
   0xd   : > { %s164_s20 = scalar_lea.vmem %s961_s0, %s752_s17  ;;  %v196_v32 = vshrl.u32 %v195_v31, 7  ;;  %v198_v33 = vand.u32 127, %v195_v31  ;;  %s924_s5 = scalar_lea.vmem %s964_s3, %s729_s29  ;;  %vm667_vm6 = vcmask 1048320  }
   0xe   : > { %v170_v2 = vld [vmem:[%s164_s20 + $0x8] sm:$0xff]  ;;  %v851_v4 = vld [vmem:[%s164_s20] sm:$0xff] }
   0xf   : > { %v189_v3 = vmul.f32 %v832_v0, %v170_v2  ;;  %v209_v5 = vmul.f32 %v832_v0, %v851_v4  ;;  %v173_v16 = vmul.f32 %v845_v1, %v170_v2  ;;  %v201_v20 = vmul.f32 %v845_v1, %v851_v4 }
  0x10   : > { %vm199_vm1 = vcmp.gt.s32.totalorder %v198_v33, %v196_v32 }
  0x11   : > { %191 = vrot.lane.b32.xlu1 %v189_v3, %s793_s16  ;;  %v889_v39 = vsel %vm199_vm1, -inf, %v798_v38 }
  0x14   : > { %185 = vrot.lane.b32.xlu0 %v845_v1, %s793_s16 }
  0x19   : > { %211 = vrot.lane.b32.xlu1 %v209_v5, %s793_s16 }
  0x7e   : > { %v176_v6 = vpop.permute.xlu0 %175 }
  0x7f   : > { %v202_v7 = vmul.f32 %v176_v6, %v851_v4  ;;  %v178_v8 = vmul.f32 %v176_v6, %v170_v2 }
  0x81   : > { %204 = vrot.lane.b32.xlu0 %v202_v7, %s794_s23  ;;  %180 = vrot.lane.b32.xlu2 %v178_v8, %s794_s23 }
  0x83   : > { %v192_v10 = vpop.permute.xlu1 %191 }
  0x86   : > { %v186_v9 = vpop.permute.xlu0 %185 }
  0x87   : > { %v188_v11 = vmul.f32 %v186_v9, %v170_v2  ;;  %v208_v13 = vmul.f32 %v186_v9, %v851_v4 }
  0x89   : > { %v194_v12 = vadd.f32 %v192_v10, %v188_v11  ;;  %332 = vrot.lane.b32.xlu0 %v832_v0, %s795_s24 }
  0x8b   : > { %219 = vrot.lane.b32.xlu2 %v194_v12, %s794_s23  ;;  %v212_v14 = vpop.permute.xlu1 %211 }
  0x8c   : > { %v214_v15 = vadd.f32 %v212_v14, %v208_v13 }
  0x8e   : > { %216 = vrot.lane.b32.xlu1 %v214_v15, %s794_s23 }
  0x91   : > { %328 = vrot.lane.b32.xlu0 %v845_v1, %s796_s25 }
  0x93   : > { %319 = vrot.lane.b32.xlu2 %v832_v0, %s796_s25 }
  0x9b   : > { %315 = vrot.lane.b32.xlu2 %v845_v1, %s795_s24 }
  0xdb   : > { %v181_v17 = vpop.permute.xlu2 %180 }
  0xdc   : > { %v183_v18 = vsub.f32 %v173_v16, %v181_v17 }
  0xde   : > { %732 = vmatpush.xpose.msk.msra.mxu1 %vm221_vm0, %v183_v18 }
  0xe5   : > { %v220_v19 = vpop.permute.xlu2 %219 }
  0xe6   : > { %730 = vmatpush.xpose.msk.msra.mxu0 %vm221_vm0, %v220_v19  ;;  %735 = vmatpush.xpose.msk.msra.mxu3 %vm221_vm0, %v220_v19 }
  0xe7   : > { %740 = vmatpush.xpose.msk.msrb.mxu1 %vm221_vm0, %v220_v19 }
  0xea   : > { %742 = vmatpush.xpose.msk.msrb.mxu3 %vm221_vm0, %v183_v18 }
  0xed   : > { %v320_v27 = vpop.permute.xlu2 %319 }
  0xee   : > { %v322_v28 = vmul.f32 %v320_v27, %v851_v4 }
  0xf0   : > { %324 = vrot.lane.b32.xlu2 %v322_v28, %s794_s23 }
  0xf3   : > { %v205_v21 = vpop.permute.xlu0 %204 }
  0xf4   : > { %v207_v22 = vsub.f32 %v201_v20, %v205_v21 }
  0xf5   : > { %v316_v44 = vpop.permute.xlu2 %315 }
  0xf6   : > { %733 = vmatmul.msk.f32.vlgmr.msra.gmra.mxu1 %vm221_vm0, %v207_v22  ;;  %v318_v45 = vmul.f32 %v316_v44, %v851_v4 }
  0xf7   : > { %747 = vmatpush.xpose.msk.msra.mxu1 %vm221_vm0, %v183_v18 }
  0xfb   : > { %v333_v23 = vpop.permute.xlu0 %332 }
  0xfc   : > { %v335_v24 = vmul.f32 %v333_v23, %v851_v4 }
  0xfe   : > { %337 = vrot.lane.b32.xlu0 %v335_v24, %s793_s16 }
 0x100   : > { %v217_v25 = vpop.permute.xlu1 %216 }
 0x101   : > { %731 = vmatmul.msk.f32.vlgmr.msra.gmra.mxu0 %vm221_vm0, %v217_v25 }
 0x103   : > { %v329_v26 = vpop.permute.xlu0 %328 }
 0x104   : > { %v331_v36 = vmul.f32 %v329_v26, %v851_v4 }
 0x106   : > { %287 = vrot.lane.b32.xlu0 %v170_v2, %s797_s26 }
 0x14a   : > { %v325_v46 = vpop.permute.xlu2 %324 }
 0x14b   : > { %v327_v47 = vsub.f32 %v318_v45, %v325_v46 }
 0x170   : > { %v338_v29 = vpop.permute.xlu0 %337 }
 0x171   : > { %v340_v41 = vadd.f32 %v338_v29, %v331_v36 }
 0x173   : > { %v269_v34 = vpop.f32.mrf.mxu1  ;;  %342 = vrot.lane.b32.xlu0 %v340_v41, %s799_s27 }
 0x178   : > { %v288_v30 = vpop.permute.xlu0 %287 }
 0x179   : > { %308 = vmatpush.msra.mxu2 %v288_v30  ;;  %422 = vmatpush.msrb.mxu0 %v288_v30 }
 0x17b   : > { %737 = vmatpush.xpose.msk.msrb.mxu2 %vm221_vm0, %v183_v18  ;;  %745 = vmatpush.xpose.msk.msra.mxu0 %vm221_vm0, %v220_v19 }
 0x17c   : > { %367 = vrot.lane.b32.xlu0 %v327_v47, %s797_s26 }
 0x17e   : > { %v243_v35 = vpop.f32.mrf.mxu0 }
 0x17f   : > { %v270_v37 = vadd.f32 %v269_v34, %v243_v35 }
 0x181   : > { %v272_v40 = vmul.f32 0.17677669, %v270_v37 }
 0x183   : > { %v273_v42 = vadd.f32 %v272_v40, %v889_v39 }
 0x184   : > { %437 = vrot.lane.b32.xlu0 %v832_v0, %s799_s27 }
 0x185   : > { %v275_v43 = vsel %vm274_vm2, %v273_v42, -inf }
 0x186   : > { %276 = vmax.xlane.f32.xlu1 %v275_v43 }
 0x18c   : > { %555 = vrot.lane.b32.xlu0 %v832_v0, %s794_s23 }
 0x19f   : > { %450 = vrot.lane.b32.xlu1 %v832_v0, %s800_s28 }
 0x1a7   : > { %446 = vrot.lane.b32.xlu1 %v845_v1, %s799_s27 }
 0x1af   : > { %433 = vrot.lane.b32.xlu1 %v845_v1, %s800_s28 }
 0x1e5   : > { %v343_v53 = vpop.permute.xlu0 %342 }
 0x1e6   : > { %736 = vmatmul.msk.f32.vlgmr.msra.gmra.mxu3 %vm221_vm0, %v343_v53 }
 0x1e7   : > { %658 = vmatpush.msra.mxu3 %v288_v30 }
 0x1ee   : > { %v368_v54 = vpop.permute.xlu0 %367 }
 0x1f6   : > { %v438_v56 = vpop.permute.xlu0 %437 }
 0x1f7   : > { %v440_v58 = vmul.f32 %v438_v56, %v851_v4 }
 0x1f9   : > { %v277_v48 = vpop.xlane.xlu1 %276  ;;  %442 = vrot.lane.b32.xlu1 %v440_v58, %s794_s23 }
 0x1fa   : > { %v278_v49 = vsub.f32 %v273_v42, %v277_v48 }
 0x1fc   : > { %v279_v50 = vmul.f32 1.442695, %v278_v49 }
 0x1fe   : > { %769 = vpow2.f32 %v279_v50  ;;  %v556_v7 = vpop.permute.xlu0 %555 }
 0x1ff   : > { %v558_v8 = vmul.f32 %v556_v7, %v851_v4 }
 0x201   : > { %564 = vrot.lane.b32.xlu1 %v845_v1, %s794_s23 }
 0x204   : > { %v770_v51 = vpop.eup %769 }
 0x205   : > { %v281_v52 = vsel %vm274_vm2, %v770_v51, 0.0 }
 0x206   : > { %282 = vadd.xlane.f32.xlu2 %v281_v52 }
 0x211   : > { %v451_v55 = vpop.permute.xlu1 %450 }
 0x212   : > { %v453_v57 = vmul.f32 %v451_v55, %v851_v4 }
 0x219   : > { %v447_v62 = vpop.permute.xlu1 %446 }
 0x21a   : > { %v449_v15 = vmul.f32 %v447_v62, %v851_v4 }
 0x21e   : > { %568 = vrot.lane.b32.xlu2 %v832_v0, %s797_s26 }
 0x221   : > { %v434_v2 = vpop.permute.xlu1 %433 }
 0x222   : > { %v436_v3 = vmul.f32 %v434_v2, %v851_v4 }
 0x226   : > { %455 = vrot.lane.b32.xlu2 %v453_v57, %s793_s16 }
 0x22e   : > { %551 = vrot.lane.b32.xlu2 %v845_v1, %s797_s26 }
 0x236   : > { %560 = vrot.lane.b32.xlu2 %v558_v8, %s794_s23 }
 0x269   : > { %v363_v9 = vpop.f32.mrf.mxu3 }
 0x26b   : > { %v443_v1 = vpop.permute.xlu1 %442 }
 0x26c   : > { %v445_v5 = vsub.f32 %v436_v3, %v443_v1 }
 0x273   : > { %v565_v18 = vpop.permute.xlu1 %564 }
 0x274   : > { %v567_v19 = vmul.f32 %v565_v18, %v851_v4 }
 0x279   : > { %v283_v59 = vpop.xlane.xlu2 %282 }
 0x27a   : > { %771 = vrcp.f32 %v283_v59 }
 0x280   : > { %v772_v60 = vpop.eup %771 }
 0x281   : > { %v285_v61 = vmul.f32 %v772_v60, %v770_v51  ;;  %v569_v63 = vpop.permute.xlu2 %568 }
 0x282   : > { %v571_v0 = vmul.f32 %v569_v63, %v851_v4 }
 0x283   : > { %734 = vmatmul.msk.f32.vlgmr.msra.gmra.mxu2 %vm274_vm2, %v285_v61 }
 0x284   : > { %540 = vmatpush.msra.mxu2 %v288_v30  ;;  %573 = vrot.lane.b32.xlu1 %v571_v0, %s793_s16 }
 0x289   : > { %v456_v16 = vpop.permute.xlu2 %455 }
 0x28a   : > { %v458_v17 = vadd.f32 %v456_v16, %v449_v15 }
 0x28b   : > { %738 = vmatmul.msk.f32.vlgmr.msrb.gmra.mxu2 %vm221_vm0, %v368_v54 }
 0x28c   : > { %485 = vrot.lane.b32.xlu1 %v445_v5, %s800_s28 }
 0x291   : > { %v552_v23 = vpop.permute.xlu2 %551 }
 0x292   : > { %v554_v24 = vmul.f32 %v552_v23, %v851_v4 }
 0x299   : > { %v561_v25 = vpop.permute.xlu2 %560 }
 0x29a   : > { %v563_v26 = vsub.f32 %v554_v24, %v561_v25 }
 0x2f6   : > { %v574_v20 = vpop.permute.xlu1 %573 }
 0x2f7   : > { %v576_v21 = vadd.f32 %v574_v20, %v567_v19 }
 0x2f9   : > { %578 = vrot.lane.b32.xlu1 %v576_v21, %s793_s16 }
 0x2fe   : > { %v486_v22 = vpop.permute.xlu1 %485 }
 0x2ff   : > { %743 = vmatmul.msk.f32.vlgmr.msrb.gmra.mxu3 %vm221_vm0, %v486_v22 }
 0x301   : > { %603 = vrot.lane.b32.xlu1 %v563_v26, %s795_s24 }
 0x306   : > { %v310_v6 = vpop.f32.mrf.mxu2 }
 0x307   : > { %314 = vst.msk [vmem:[%s924_s5] sm:$0xff] %vm313_vm3, %v310_v6 }
 0x30e   : > { %v388_v10 = vpop.f32.mrf.mxu2 }
 0x30f   : > { %v389_v11 = vadd.f32 %v388_v10, %v363_v9 }
 0x311   : > { %v391_v12 = vmul.f32 0.17677669, %v389_v11 }
 0x313   : > { %v392_v13 = vadd.f32 %v391_v12, %v889_v39 }
 0x315   : > { %v393_v14 = vsel %vm274_vm2, %v392_v13, -inf }
 0x316   : > { %394 = vmax.xlane.f32.xlu0 %v393_v14 }
 0x32a   : > { %460 = vrot.lane.b32.xlu0 %v458_v17, %s796_s25 }
 0x36b   : > { %v579_v33 = vpop.permute.xlu1 %578 }
 0x373   : > { %v604_v34 = vpop.permute.xlu1 %603 }
 0x382   : > { %v506_v37 = vpop.f32.mrf.mxu3 }
 0x389   : > { %v395_v27 = vpop.xlane.xlu0 %394 }
 0x38a   : > { %v396_v28 = vsub.f32 %v392_v13, %v395_v27 }
 0x38c   : > { %v397_v29 = vmul.f32 1.442695, %v396_v28 }
 0x38e   : > { %773 = vpow2.f32 %v397_v29 }
 0x394   : > { %v774_v30 = vpop.eup %773 }
 0x395   : > { %v399_v31 = vsel %vm274_vm2, %v774_v30, 0.0 }
 0x396   : > { %400 = vadd.xlane.f32.xlu2 %v399_v31 }
 0x39c   : > { %v461_v32 = vpop.permute.xlu0 %460 }
 0x39d   : > { %741 = vmatmul.msk.f32.vlgmr.msrb.gmra.mxu1 %vm221_vm0, %v461_v32 }
 0x3a5   : > { %748 = vmatmul.msk.f32.vlgmr.msra.gmra.mxu1 %vm221_vm0, %v604_v34 }
 0x409   : > { %v401_v4 = vpop.xlane.xlu2 %400 }
 0x40a   : > { %775 = vrcp.f32 %v401_v4 }
 0x410   : > { %v776_v35 = vpop.eup %775 }
 0x411   : > { %v403_v36 = vmul.f32 %v776_v35, %v774_v30 }
 0x413   : > { %739 = vmatmul.msk.f32.vlgmr.msrb.gmra.mxu0 %vm274_vm2, %v403_v36 }
 0x41a   : > { %v481_v38 = vpop.f32.mrf.mxu1 }
 0x41b   : > { %v507_v40 = vadd.f32 %v506_v37, %v481_v38  ;;  %746 = vmatmul.msk.f32.vlgmr.msra.gmra.mxu0 %vm221_vm0, %v579_v33 }
 0x41d   : > { %v509_v41 = vmul.f32 0.17677669, %v507_v40 }
 0x41f   : > { %v510_v42 = vadd.f32 %v509_v41, %v889_v39 }
 0x421   : > { %v511_v43 = vsel %vm274_vm2, %v510_v42, -inf }
 0x422   : > { %512 = vmax.xlane.f32.xlu0 %v511_v43  ;;  %v624_v47 = vpop.f32.mrf.mxu1 }
 0x490   : > { %v424_v44 = vpop.f32.mrf.mxu0 }
 0x495   : > { %v513_v45 = vpop.xlane.xlu0 %512 }
 0x496   : > { %v514_v46 = vsub.f32 %v510_v42, %v513_v45 }
 0x498   : > { %v515_v48 = vmul.f32 1.442695, %v514_v46  ;;  %v599_v49 = vpop.f32.mrf.mxu0 }
 0x499   : > { %v625_v50 = vadd.f32 %v624_v47, %v599_v49 }
 0x49a   : > { %777 = vpow2.f32 %v515_v48 }
 0x49b   : > { %v627_v51 = vmul.f32 0.17677669, %v625_v50 }
 0x49d   : > { %v628_v52 = vadd.f32 %v627_v51, %v889_v39 }
 0x49f   : > { %v629_v53 = vsel %vm274_vm2, %v628_v52, -inf }
 0x4a0   : > { %v778_v54 = vpop.eup %777  ;;  %630 = vmax.xlane.f32.xlu1 %v629_v53 }
 0x4a1   : > { %v517_v55 = vsel %vm274_vm2, %v778_v54, 0.0 }
 0x4a2   : > { %518 = vadd.xlane.f32.xlu2 %v517_v55 }
 0x513   : > { %v631_v56 = vpop.xlane.xlu1 %630 }
 0x514   : > { %v632_v57 = vsub.f32 %v628_v52, %v631_v56 }
 0x515   : > { %v519_v58 = vpop.xlane.xlu2 %518 }
 0x516   : > { %v633_v59 = vmul.f32 1.442695, %v632_v57  ;;  %779 = vrcp.f32 %v519_v58 }
 0x518   : > { %781 = vpow2.f32 %v633_v59 }
 0x51c   : > { %v780_v60 = vpop.eup %779 }
 0x51d   : > { %v521_v61 = vmul.f32 %v780_v60, %v778_v54 }
 0x51e   : > { %v782_v62 = vpop.eup %781 }
 0x51f   : > { %744 = vmatmul.msk.f32.vlgmr.msra.gmra.mxu2 %vm274_vm2, %v521_v61  ;;  %v635_v39 = vsel %vm274_vm2, %v782_v62, 0.0 }
 0x520   : > { %636 = vadd.xlane.f32.xlu2 %v635_v39 }
 0x538   : > { %428 = vrot.lane.b32.xlu2 %v424_v44, %s795_s24 }
 0x593   : > { %v637_v63 = vpop.xlane.xlu2 %636 }
 0x594   : > { %783 = vrcp.f32 %v637_v63 }
 0x59a   : > { %v784_v0 = vpop.eup %783 }
 0x59b   : > { %v639_v2 = vmul.f32 %v784_v0, %v782_v62  ;;  %v429_v3 = vpop.permute.xlu2 %428 }
 0x59c   : > { %432 = vst.msk [vmem:[%s924_s5] sm:$0xff] %vm431_vm4, %v429_v3 }
 0x59d   : > { %749 = vmatmul.msk.f32.vlgmr.msra.gmra.mxu3 %vm274_vm2, %v639_v2 }
 0x5a2   : > { %v542_v1 = vpop.f32.mrf.mxu2 }
 0x5a3   : > { %546 = vrot.lane.b32.xlu0 %v542_v1, %s800_s28 }
 0x615   : > { %v547_v5 = vpop.permute.xlu0 %546 }
 0x616   : > { %550 = vst.msk [vmem:[%s924_s5] sm:$0xff] %vm549_vm5, %v547_v5 }
 0x620   : > { %v660_v6 = vpop.f32.mrf.mxu3 }
 0x621   : > { %664 = vrot.lane.b32.xlu1 %v660_v6, %s797_s26 }
 0x693   : > { %v665_v7 = vpop.permute.xlu1 %664 }
 0x694   : > { %668 = vst.msk [vmem:[%s924_s5] sm:$0xff] %vm667_vm6, %v665_v7 }
 0x695 PF: > { %s13_s12 = sadd.s32 1, %s791_s12  }
 0x696   : > { %p10_p4 = scmp.ge.s32.totalorder %s13_s12, 4  }
 0x698   :  { %12 = sbr.rel (!%p10_p4) target bundleno = 1 (0x1), region = 62 }

// kernel: llama2_block.7
= control target key start
LH: loop header
LB: loop body
LE: loop exit
PB: predicated region body
PF: predicated region fallthrough
CT: control target
= control target key end

     0   :  { %10 = vsyncpa [#allocation5], 0  ;;  %s777_s0 = inlined_call_operand.vmem [shape: f32[16,128], index: 0, kind: input, shape index: {}]   ;;  %s778_s1 = inlined_call_operand.vmem [shape: f32[1,128], index: 1, kind: input, shape index: {}]   ;;  %s779_s2 = inlined_call_operand.vmem [shape: f32[128,256], index: 2, kind: input, shape index: {}]   ;;  %s780_s3 = inlined_call_operand.hbm [shape: f32[128,256], index: 3, kind: input, shape index: {}]   ;;  %s781_s4 = inlined_call_operand.hbm [shape: f32[256,128], index: 4, kind: input, shape index: {}]   ;;  %s782_s5 = inlined_call_operand.hbm [shape: f32[16,128], index: 5, kind: output, shape index: {}]  }
   0x1   :  { %11 = vsyncpa [#allocation8], 0 }
   0x2   :  { %12 = vsyncpa [#allocation6], 0  ;;  %s23_s20 = sshll.u32 %s780_s3, 4  ;;  %s592_s21 = smov [#allocation4]   ;;  %s24_s20 = int_to_ptr.hbm [resolvable:$true] %s23_s20 }
   0x3   :  { %s25_s22 = sshll.u32 %s592_s21, 4  ;;  %s36_s25 = sshll.u32 %s781_s4, 4  ;;  %s26_s22 = int_to_ptr.vmem [resolvable:$true] %s25_s22  ;;  %s37_s25 = int_to_ptr.hbm [resolvable:$true] %s36_s25 }
   0x4   :  { %s593_s26 = smov 256   ;;  %s594_s27 = smov 16  }
   0x5   :  { %31 = dma.hbm_to_vmem [thread:$0]  %s24_s20, 4096, %s26_s22, [#allocation5], %s593_s26, %s593_s26, %s594_s27  }
   0x6   :  { %s595_s28 = smov [#allocation7]   ;;  %s596_s30 = smov 128  }
   0x7   :  { %s38_s29 = sshll.u32 %s595_s28, 4  ;;  %s597_s6 = smov 8   ;;  %s39_s29 = int_to_ptr.vmem [resolvable:$true] %s38_s29 }
   0x8   :  { %44 = dma.hbm_to_vmem [thread:$0]  %s37_s25, 4096, %s39_s29, [#allocation8], %s596_s30, %s596_s30, %s597_s6  }
   0x9   :  { %586 = dma.done.wait [#allocation5], 4096  }
   0xa   :  { %587 = vsyncadd [#allocation5], 4294963200 }
   0xb   :  { %588 = dma.done.wait [#allocation8], 4096  }
   0xc   :  { %589 = vsyncadd [#allocation8], 4294963200  ;;  %v641_v0 = vld [vmem:[%s777_s0] sm:$0xff]  ;;  %v133_v1 = vld [vmem:[%s779_s2 + $0xf0] sm:$0xff]  ;;  %s440_s24 = sshll.u32 %s782_s5, 4  ;;  %s441_s24 = int_to_ptr.hbm [resolvable:$true] %s440_s24 }
   0xd   :  { %v61_v2 = vmul.f32 %v641_v0, %v641_v0  ;;  %135 = vmatpush.msra.mxu0 %v133_v1  ;;  %v134_v3 = vld [vmem:[%s779_s2 + $0xf8] sm:$0xff]  ;;  %v211_v4 = vld [vmem:[#allocation4 + $0xf0] sm:$0xff]  ;;  %v654_v6 = vld [vmem:[%s777_s0 + $0x8] sm:$0xff] }
   0xe   :  { %v212_v5 = vld [vmem:[#allocation4 + $0xf8] sm:$0xff]  ;;  %158 = vmatpush.msra.mxu1 %v134_v3  ;;  %213 = vmatpush.msra.mxu2 %v211_v4  ;;  %v131_v7 = vld [vmem:[%s779_s2 + $0xe0] sm:$0xff]  ;;  %v132_v8 = vld [vmem:[%s779_s2 + $0xe8] sm:$0xff]  ;;  %v62_v15 = vmul.f32 %v654_v6, %v654_v6 }
   0xf   :  { %v209_v9 = vld [vmem:[#allocation4 + $0xe0] sm:$0xff]  ;;  %63 = vadd.xlane.f32.xlu0 %v61_v2  ;;  %236 = vmatpush.msra.mxu3 %v212_v5  ;;  %v210_v10 = vld [vmem:[#allocation4 + $0xe8] sm:$0xff]  ;;  %v129_v11 = vld [vmem:[%s779_s2 + $0xd0] sm:$0xff] }
  0x10   :  { %v130_v12 = vld [vmem:[%s779_s2 + $0xd8] sm:$0xff]  ;;  %136 = vmatpush.msra.mxu0 %v131_v7  ;;  %159 = vmatpush.msra.mxu1 %v132_v8  ;;  %v207_v13 = vld [vmem:[#allocation4 + $0xd0] sm:$0xff]  ;;  %v127_v16 = vld [vmem:[%s779_s2 + $0xc0] sm:$0xff] }
  0x11   :  { %v208_v14 = vld [vmem:[#allocation4 + $0xd8] sm:$0xff]  ;;  %214 = vmatpush.msra.mxu2 %v209_v9  ;;  %237 = vmatpush.msra.mxu3 %v210_v10  ;;  %v128_v17 = vld [vmem:[%s779_s2 + $0xc8] sm:$0xff]  ;;  %v205_v18 = vld [vmem:[#allocation4 + $0xc0] sm:$0xff] }
  0x12   :  { %137 = vmatpush.msra.mxu0 %v129_v11  ;;  %160 = vmatpush.msra.mxu1 %v130_v12  ;;  %v206_v19 = vld [vmem:[#allocation4 + $0xc8] sm:$0xff]  ;;  %v125_v20 = vld [vmem:[%s779_s2 + $0xb0] sm:$0xff]  ;;  %v126_v21 = vld [vmem:[%s779_s2 + $0xb8] sm:$0xff] }
  0x13   :  { %215 = vmatpush.msra.mxu2 %v207_v13  ;;  %238 = vmatpush.msra.mxu3 %v208_v14  ;;  %v203_v22 = vld [vmem:[#allocation4 + $0xb0] sm:$0xff]  ;;  %v204_v23 = vld [vmem:[#allocation4 + $0xb8] sm:$0xff]  ;;  %v123_v24 = vld [vmem:[%s779_s2 + $0xa0] sm:$0xff] }
  0x14   :  { %138 = vmatpush.msra.mxu0 %v127_v16  ;;  %161 = vmatpush.msra.mxu1 %v128_v17  ;;  %v124_v25 = vld [vmem:[%s779_s2 + $0xa8] sm:$0xff]  ;;  %v201_v26 = vld [vmem:[#allocation4 + $0xa0] sm:$0xff]  ;;  %v121_v28 = vld [vmem:[%s779_s2 + $0x90] sm:$0xff] }
  0x15   :  { %216 = vmatpush.msra.mxu2 %v205_v18  ;;  %239 = vmatpush.msra.mxu3 %v206_v19  ;;  %v202_v27 = vld [vmem:[#allocation4 + $0xa8] sm:$0xff]  ;;  %v122_v29 = vld [vmem:[%s779_s2 + $0x98] sm:$0xff]  ;;  %v199_v30 = vld [vmem:[#allocation4 + $0x90] sm:$0xff] }
  0x16   :  { %139 = vmatpush.msra.mxu0 %v125_v20  ;;  %162 = vmatpush.msra.mxu1 %v126_v21  ;;  %v200_v31 = vld [vmem:[#allocation4 + $0x98] sm:$0xff]  ;;  %v119_v32 = vld [vmem:[%s779_s2 + $0x80] sm:$0xff]  ;;  %v120_v33 = vld [vmem:[%s779_s2 + $0x88] sm:$0xff] }
  0x17   :  { %65 = vadd.xlane.f32.xlu0 %v62_v15  ;;  %217 = vmatpush.msra.mxu2 %v203_v22  ;;  %v197_v34 = vld [vmem:[#allocation4 + $0x80] sm:$0xff]  ;;  %v198_v35 = vld [vmem:[#allocation4 + $0x88] sm:$0xff]  ;;  %v117_v36 = vld [vmem:[%s779_s2 + $0x70] sm:$0xff] }
  0x18   :  { %240 = vmatpush.msra.mxu3 %v204_v23  ;;  %140 = vmatpush.msra.mxu0 %v123_v24  ;;  %v118_v37 = vld [vmem:[%s779_s2 + $0x78] sm:$0xff]  ;;  %v195_v38 = vld [vmem:[#allocation4 + $0x70] sm:$0xff]  ;;  %v115_v40 = vld [vmem:[%s779_s2 + $0x60] sm:$0xff] }
  0x19   :  { %163 = vmatpush.msra.mxu1 %v124_v25  ;;  %218 = vmatpush.msra.mxu2 %v201_v26  ;;  %v196_v39 = vld [vmem:[#allocation4 + $0x78] sm:$0xff]  ;;  %v116_v41 = vld [vmem:[%s779_s2 + $0x68] sm:$0xff]  ;;  %v193_v42 = vld [vmem:[#allocation4 + $0x60] sm:$0xff] }
  0x1a   :  { %241 = vmatpush.msra.mxu3 %v202_v27  ;;  %141 = vmatpush.msra.mxu0 %v121_v28  ;;  %v194_v43 = vld [vmem:[#allocation4 + $0x68] sm:$0xff]  ;;  %v113_v44 = vld [vmem:[%s779_s2 + $0x50] sm:$0xff]  ;;  %v114_v45 = vld [vmem:[%s779_s2 + $0x58] sm:$0xff] }
  0x1b   :  { %164 = vmatpush.msra.mxu1 %v122_v29  ;;  %219 = vmatpush.msra.mxu2 %v199_v30  ;;  %v191_v46 = vld [vmem:[#allocation4 + $0x50] sm:$0xff]  ;;  %v192_v47 = vld [vmem:[#allocation4 + $0x58] sm:$0xff]  ;;  %v111_v48 = vld [vmem:[%s779_s2 + $0x40] sm:$0xff] }
  0x1c   :  { %242 = vmatpush.msra.mxu3 %v200_v31  ;;  %142 = vmatpush.msra.mxu0 %v119_v32  ;;  %v112_v49 = vld [vmem:[%s779_s2 + $0x48] sm:$0xff]  ;;  %v189_v50 = vld [vmem:[#allocation4 + $0x40] sm:$0xff]  ;;  %v109_v52 = vld [vmem:[%s779_s2 + $0x30] sm:$0xff] }
  0x1d   :  { %165 = vmatpush.msra.mxu1 %v120_v33  ;;  %220 = vmatpush.msra.mxu2 %v197_v34  ;;  %v190_v51 = vld [vmem:[#allocation4 + $0x48] sm:$0xff]  ;;  %v110_v53 = vld [vmem:[%s779_s2 + $0x38] sm:$0xff]  ;;  %v187_v54 = vld [vmem:[#allocation4 + $0x30] sm:$0xff] }
  0x1e   :  { %243 = vmatpush.msra.mxu3 %v198_v35  ;;  %143 = vmatpush.msra.mxu0 %v117_v36  ;;  %v188_v55 = vld [vmem:[#allocation4 + $0x38] sm:$0xff]  ;;  %v107_v56 = vld [vmem:[%s779_s2 + $0x20] sm:$0xff]  ;;  %v108_v57 = vld [vmem:[%s779_s2 + $0x28] sm:$0xff] }
  0x1f   :  { %166 = vmatpush.msra.mxu1 %v118_v37  ;;  %221 = vmatpush.msra.mxu2 %v195_v38  ;;  %v185_v58 = vld [vmem:[#allocation4 + $0x20] sm:$0xff]  ;;  %v186_v59 = vld [vmem:[#allocation4 + $0x28] sm:$0xff]  ;;  %v105_v60 = vld [vmem:[%s779_s2 + $0x10] sm:$0xff] }
  0x20   :  { %244 = vmatpush.msra.mxu3 %v196_v39  ;;  %144 = vmatpush.msra.mxu0 %v115_v40  ;;  %v106_v61 = vld [vmem:[%s779_s2 + $0x18] sm:$0xff]  ;;  %v183_v62 = vld [vmem:[#allocation4 + $0x10] sm:$0xff]  ;;  %v103_v1 = vld [vmem:[%s779_s2] sm:$0xff] }
  0x21   :  { %167 = vmatpush.msra.mxu1 %v116_v41  ;;  %222 = vmatpush.msra.mxu2 %v193_v42  ;;  %v184_v63 = vld [vmem:[#allocation4 + $0x18] sm:$0xff]  ;;  %v104_v2 = vld [vmem:[%s779_s2 + $0x8] sm:$0xff]  ;;  %v181_v3 = vld [vmem:[#allocation4] sm:$0xff] }
  0x22   :  { %245 = vmatpush.msra.mxu3 %v194_v43  ;;  %145 = vmatpush.msra.mxu0 %v113_v44  ;;  %v182_v4 = vld [vmem:[#allocation4 + $0x8] sm:$0xff]  ;;  %v493_v20 = vld [vmem:[%s778_s1] ss:$0 sm:$0xff]  ;;  %v360_v31 = vld [vmem:[#allocation7 + $0x78] sm:$0xff]  ;;  %s598_s1 = smov [#allocation9]  }
  0x23   :  { %168 = vmatpush.msra.mxu1 %v114_v45  ;;  %223 = vmatpush.msra.mxu2 %v191_v46  ;;  %v376_v32 = vld [vmem:[#allocation7 + $0xf8] sm:$0xff]  ;;  %v359_v33 = vld [vmem:[#allocation7 + $0x70] sm:$0xff]  ;;  %v358_v35 = vld [vmem:[#allocation7 + $0x68] sm:$0xff]  ;;  %s438_s21 = sshll.u32 %s598_s1, 4  ;;  %s439_s21 = int_to_ptr.vmem [resolvable:$true] %s438_s21 }
  0x24   :  { %246 = vmatpush.msra.mxu3 %v192_v47  ;;  %146 = vmatpush.msra.mxu0 %v111_v48  ;;  %v375_v34 = vld [vmem:[#allocation7 + $0xf0] sm:$0xff]  ;;  %v374_v36 = vld [vmem:[#allocation7 + $0xe8] sm:$0xff]  ;;  %v357_v37 = vld [vmem:[#allocation7 + $0x60] sm:$0xff] }
  0x25   :  { %169 = vmatpush.msra.mxu1 %v112_v49  ;;  %224 = vmatpush.msra.mxu2 %v189_v50  ;;  %v373_v38 = vld [vmem:[#allocation7 + $0xe0] sm:$0xff]  ;;  %v356_v39 = vld [vmem:[#allocation7 + $0x58] sm:$0xff]  ;;  %v355_v41 = vld [vmem:[#allocation7 + $0x50] sm:$0xff] }
  0x26   :  { %247 = vmatpush.msra.mxu3 %v190_v51  ;;  %147 = vmatpush.msra.mxu0 %v109_v52  ;;  %v372_v40 = vld [vmem:[#allocation7 + $0xd8] sm:$0xff]  ;;  %v371_v42 = vld [vmem:[#allocation7 + $0xd0] sm:$0xff]  ;;  %v354_v43 = vld [vmem:[#allocation7 + $0x48] sm:$0xff] }
  0x27   :  { %170 = vmatpush.msra.mxu1 %v110_v53  ;;  %225 = vmatpush.msra.mxu2 %v187_v54  ;;  %v370_v44 = vld [vmem:[#allocation7 + $0xc8] sm:$0xff]  ;;  %v353_v45 = vld [vmem:[#allocation7 + $0x40] sm:$0xff]  ;;  %v352_v47 = vld [vmem:[#allocation7 + $0x38] sm:$0xff] }
  0x28   :  { %248 = vmatpush.msra.mxu3 %v188_v55  ;;  %148 = vmatpush.msra.mxu0 %v107_v56  ;;  %v369_v46 = vld [vmem:[#allocation7 + $0xc0] sm:$0xff]  ;;  %v368_v48 = vld [vmem:[#allocation7 + $0xb8] sm:$0xff]  ;;  %v351_v49 = vld [vmem:[#allocation7 + $0x30] sm:$0xff] }
  0x29   :  { %171 = vmatpush.msra.mxu1 %v108_v57  ;;  %226 = vmatpush.msra.mxu2 %v185_v58  ;;  %v367_v50 = vld [vmem:[#allocation7 + $0xb0] sm:$0xff]  ;;  %v350_v51 = vld [vmem:[#allocation7 + $0x28] sm:$0xff]  ;;  %v349_v53 = vld [vmem:[#allocation7 + $0x20] sm:$0xff] }
  0x2a   :  { %249 = vmatpush.msra.mxu3 %v186_v59  ;;  %149 = vmatpush.msra.mxu0 %v105_v60  ;;  %v366_v52 = vld [vmem:[#allocation7 + $0xa8] sm:$0xff]  ;;  %v365_v54 = vld [vmem:[#allocation7 + $0xa0] sm:$0xff]  ;;  %v348_v55 = vld [vmem:[#allocation7 + $0x18] sm:$0xff] }
  0x2b   :  { %172 = vmatpush.msra.mxu1 %v106_v61  ;;  %227 = vmatpush.msra.mxu2 %v183_v62  ;;  %v364_v56 = vld [vmem:[#allocation7 + $0x98] sm:$0xff]  ;;  %v347_v61 = vld [vmem:[#allocation7 + $0x10] sm:$0xff] }
  0x2c   :  { %250 = vmatpush.msra.mxu3 %v184_v63  ;;  %150 = vmatpush.msra.mxu0 %v103_v1  ;;  %v363_v62 = vld [vmem:[#allocation7 + $0x90] sm:$0xff] }
  0x2d   :  { %173 = vmatpush.msra.mxu1 %v104_v2  ;;  %228 = vmatpush.msra.mxu2 %v181_v3  ;;  %v346_v2 = vld [vmem:[#allocation7 + $0x8] sm:$0xff] }
  0x2e   :  { %251 = vmatpush.msra.mxu3 %v182_v4  ;;  %377 = vmatpush.msrb.mxu0 %v360_v31  ;;  %v362_v3 = vld [vmem:[#allocation7 + $0x88] sm:$0xff]  ;;  %v345_v4 = vld [vmem:[#allocation7] sm:$0xff] }
  0x2f   :  { %400 = vmatpush.msrb.mxu1 %v376_v32  ;;  %454 = vmatpush.msrb.mxu2 %v360_v31 }
  0x30   :  { %470 = vmatpush.msrb.mxu3 %v376_v32  ;;  %378 = vmatpush.msrb.mxu0 %v359_v33 }
  0x31   :  { %401 = vmatpush.msrb.mxu1 %v375_v34  ;;  %455 = vmatpush.msrb.mxu2 %v359_v33 }
  0x32   :  { %471 = vmatpush.msrb.mxu3 %v375_v34  ;;  %379 = vmatpush.msrb.mxu0 %v358_v35 }
  0x33   :  { %402 = vmatpush.msrb.mxu1 %v374_v36  ;;  %456 = vmatpush.msrb.mxu2 %v358_v35 }
  0x34   :  { %472 = vmatpush.msrb.mxu3 %v374_v36  ;;  %380 = vmatpush.msrb.mxu0 %v357_v37 }
  0x35   :  { %403 = vmatpush.msrb.mxu1 %v373_v38  ;;  %457 = vmatpush.msrb.mxu2 %v357_v37 }
  0x36   :  { %473 = vmatpush.msrb.mxu3 %v373_v38  ;;  %381 = vmatpush.msrb.mxu0 %v356_v39 }
  0x37   :  { %404 = vmatpush.msrb.mxu1 %v372_v40  ;;  %458 = vmatpush.msrb.mxu2 %v356_v39 }
  0x38   :  { %474 = vmatpush.msrb.mxu3 %v372_v40  ;;  %382 = vmatpush.msrb.mxu0 %v355_v41 }
  0x39   :  { %405 = vmatpush.msrb.mxu1 %v371_v42  ;;  %459 = vmatpush.msrb.mxu2 %v355_v41 }
  0x3a   :  { %475 = vmatpush.msrb.mxu3 %v371_v42  ;;  %383 = vmatpush.msrb.mxu0 %v354_v43 }
  0x3b   :  { %406 = vmatpush.msrb.mxu1 %v370_v44  ;;  %460 = vmatpush.msrb.mxu2 %v354_v43 }
  0x3c   :  { %476 = vmatpush.msrb.mxu3 %v370_v44  ;;  %384 = vmatpush.msrb.mxu0 %v353_v45 }
  0x3d   :  { %407 = vmatpush.msrb.mxu1 %v369_v46  ;;  %461 = vmatpush.msrb.mxu2 %v353_v45 }
  0x3e   :  { %477 = vmatpush.msrb.mxu3 %v369_v46  ;;  %385 = vmatpush.msrb.mxu0 %v352_v47 }
  0x3f   :  { %408 = vmatpush.msrb.mxu1 %v368_v48  ;;  %462 = vmatpush.msrb.mxu2 %v352_v47 }
  0x40   :  { %478 = vmatpush.msrb.mxu3 %v368_v48  ;;  %386 = vmatpush.msrb.mxu0 %v351_v49 }
  0x41   :  { %409 = vmatpush.msrb.mxu1 %v367_v50  ;;  %463 = vmatpush.msrb.mxu2 %v351_v49 }
  0x42   :  { %479 = vmatpush.msrb.mxu3 %v367_v50  ;;  %387 = vmatpush.msrb.mxu0 %v350_v51 }
  0x43   :  { %410 = vmatpush.msrb.mxu1 %v366_v52  ;;  %464 = vmatpush.msrb.mxu2 %v350_v51 }
  0x44   :  { %480 = vmatpush.msrb.mxu3 %v366_v52  ;;  %388 = vmatpush.msrb.mxu0 %v349_v53 }
  0x45   :  { %411 = vmatpush.msrb.mxu1 %v365_v54  ;;  %465 = vmatpush.msrb.mxu2 %v349_v53 }
  0x46   :  { %481 = vmatpush.msrb.mxu3 %v365_v54  ;;  %389 = vmatpush.msrb.mxu0 %v348_v55 }
  0x47   :  { %412 = vmatpush.msrb.mxu1 %v364_v56  ;;  %466 = vmatpush.msrb.mxu2 %v348_v55 }
  0x48   :  { %482 = vmatpush.msrb.mxu3 %v364_v56  ;;  %390 = vmatpush.msrb.mxu0 %v347_v61 }
  0x49   :  { %413 = vmatpush.msrb.mxu1 %v363_v62  ;;  %467 = vmatpush.msrb.mxu2 %v347_v61 }
  0x4a   :  { %483 = vmatpush.msrb.mxu3 %v363_v62  ;;  %391 = vmatpush.msrb.mxu0 %v346_v2 }
  0x4b   :  { %414 = vmatpush.msrb.mxu1 %v362_v3  ;;  %468 = vmatpush.msrb.mxu2 %v346_v2 }
  0x4c   :  { %484 = vmatpush.msrb.mxu3 %v362_v3  ;;  %392 = vmatpush.msrb.mxu0 %v345_v4 }
  0x4d   :  { %469 = vmatpush.msrb.mxu2 %v345_v4 }
  0x82   :  { %v64_v5 = vpop.xlane.xlu0 %63 }
  0x83   :  { %v67_v7 = vmul.f32 0.0078125, %v64_v5  ;;  %v361_v5 = vld [vmem:[#allocation7 + $0x80] sm:$0xff] }
  0x84   :  { %415 = vmatpush.msrb.mxu1 %v361_v5  ;;  %485 = vmatpush.msrb.mxu3 %v361_v5 }
  0x85   :  { %v69_v8 = vadd.f32 1e-06, %v67_v7 }
  0x87   :  { %494 = vrsqrt.f32 %v69_v8  ;;  %vm77_vm1 = vweird.f32 %v69_v8 }
  0x8a   :  { %v66_v9 = vpop.xlane.xlu0 %65 }
  0x8b   :  { %v68_v10 = vmul.f32 0.0078125, %v66_v9 }
  0x8d   :  { %v495_v11 = vpop.eup %494  ;;  %v70_v12 = vadd.f32 1e-06, %v68_v10 }
  0x8e   :  { %v72_v13 = vmul.f32 %v495_v11, %v69_v8  ;;  %vm78_vm0 = vweird.f32 %v495_v11 }
  0x8f   :  { %496 = vrsqrt.f32 %v70_v12  ;;  %vm79_vm2 = vmor %vm77_vm1, %vm78_vm0  ;;  %vm87_vm4 = vweird.f32 %v70_v12 }
  0x90   :  { %v73_v14 = vmul.f32 %v495_v11, %v72_v13 }
  0x92   :  { %v74_v15 = vmul.f32 0.5, %v73_v14 }
  0x94   :  { %v75_v16 = vsub.f32 1.5, %v74_v15 }
  0x95   :  { %v497_v17 = vpop.eup %496 }
  0x96   :  { %v76_v18 = vmul.f32 %v495_v11, %v75_v16  ;;  %v82_v19 = vmul.f32 %v497_v17, %v70_v12  ;;  %vm88_vm3 = vweird.f32 %v497_v17 }
  0x97   :  { %vm89_vm5 = vmor %vm87_vm4, %vm88_vm3 }
  0x98   :  { %v80_v21 = vsel %vm79_vm2, %v495_v11, %v76_v18  ;;  %v83_v22 = vmul.f32 %v497_v17, %v82_v19 }
  0x99   :  { %v91_v23 = vmul.f32 %v80_v21, %v641_v0 }
  0x9a   :  { %v84_v24 = vmul.f32 0.5, %v83_v22 }
  0x9b   :  { %v97_v25 = vmul.f32 %v493_v20, %v91_v23 }
  0x9c   :  { %v85_v26 = vsub.f32 1.5, %v84_v24 }
  0x9d   :  { %151 = vmatmul.f32.vlgmr.msra.gmra.mxu0 %v97_v25  ;;  %174 = vmatmul.f32.vlgmr.msra.gmra.mxu1 %v97_v25 }
  0x9e   :  { %v86_v27 = vmul.f32 %v497_v17, %v85_v26  ;;  %229 = vmatmul.f32.vlgmr.msra.gmra.mxu2 %v97_v25  ;;  %252 = vmatmul.f32.vlgmr.msra.gmra.mxu3 %v97_v25 }
  0xa0   :  { %v90_v28 = vsel %vm89_vm5, %v497_v17, %v86_v27 }
  0xa1   :  { %v92_v29 = vmul.f32 %v90_v28, %v654_v6 }
  0xa3   :  { %v98_v30 = vmul.f32 %v493_v20, %v92_v29 }
  0xa5   :  { %154 = vmatmul.f32.gmra.mxu0 %v98_v30  ;;  %177 = vmatmul.f32.gmra.mxu1 %v98_v30 }
  0xa6   :  { %232 = vmatmul.f32.gmra.mxu2 %v98_v30  ;;  %255 = vmatmul.f32.gmra.mxu3 %v98_v30 }
 0x11a   :  { %v753_v57 = vpop.f32.mrf.mxu0  ;;  %v755_v58 = vpop.f32.mrf.mxu1 }
 0x11b   :  { %v259_v59 = vsub.f32 0.0, %v753_v57  ;;  %v260_v60 = vsub.f32 0.0, %v755_v58 }
 0x11d   :  { %v263_v63 = vmul.f32 1.442695, %v259_v59  ;;  %v265_v1 = vmul.f32 1.442695, %v260_v60 }
 0x11f   :  { %498 = vpow2.f32 %v263_v63 }
 0x120   :  { %500 = vpow2.f32 %v265_v1 }
 0x121   :  { %v230_v42 = vpop.f32.mrf.mxu2  ;;  %v253_v51 = vpop.f32.mrf.mxu3 }
 0x122   :  { %v759_v7 = vpop.f32.mrf.mxu0  ;;  %v761_v8 = vpop.f32.mrf.mxu1 }
 0x123   :  { %v261_v9 = vsub.f32 0.0, %v759_v7  ;;  %v262_v10 = vsub.f32 0.0, %v761_v8 }
 0x125   :  { %v499_v11 = vpop.eup %498  ;;  %v267_v12 = vmul.f32 1.442695, %v261_v9  ;;  %v269_v15 = vmul.f32 1.442695, %v262_v10 }
 0x126   :  { %v501_v13 = vpop.eup %500  ;;  %v271_v14 = vadd.f32 1.0, %v499_v11 }
 0x127   :  { %v272_v16 = vadd.f32 1.0, %v501_v13  ;;  %502 = vpow2.f32 %v267_v12 }
 0x128   :  { %504 = vrcp.f32 %v271_v14  ;;  %v284_v26 = vand.u32 2147483647, %v271_v14  ;;  %v286_v27 = vand.u32 2147483648, %v271_v14  ;;  %vm280_vm8 = vweird.f32 %v271_v14 }
 0x129   :  { %506 = vrcp.f32 %v272_v16  ;;  %v301_v30 = vand.u32 2147483648, %v272_v16  ;;  %v299_v32 = vand.u32 2147483647, %v272_v16  ;;  %vm295_vm10 = vweird.f32 %v272_v16  ;;  %v233_v4 = vpop.f32.mrf.mxu2  ;;  %v256_v11 = vpop.f32.mrf.mxu3 }
 0x12a   :  { %508 = vpow2.f32 %v269_v15  ;;  %v287_v35 = vor.u32 1.1754944e-38, %v286_v27  ;;  %vm285_vm11 = vcmp.eq.f32.partialorder %v284_v26, 8.507059e+37 }
 0x12b   :  { %v302_v38 = vor.u32 1.1754944e-38, %v301_v30  ;;  %vm300_vm13 = vcmp.eq.f32.partialorder %v299_v32, 8.507059e+37 }
 0x12d   :  { %v503_v17 = vpop.eup %502 }
 0x12e   :  { %v505_v18 = vpop.eup %504  ;;  %v273_v19 = vadd.f32 1.0, %v503_v17 }
 0x12f   :  { %v507_v20 = vpop.eup %506  ;;  %v276_v21 = vmul.f32 %v505_v18, %v271_v14  ;;  %vm281_vm6 = vweird.f32 %v505_v18 }
 0x130   :  { %v509_v22 = vpop.eup %508  ;;  %v291_v23 = vmul.f32 %v507_v20, %v272_v16  ;;  %510 = vrcp.f32 %v273_v19  ;;  %vm296_vm7 = vweird.f32 %v507_v20  ;;  %vm282_vm9 = vmor %vm280_vm8, %vm281_vm6  ;;  %v316_v48 = vand.u32 2147483648, %v273_v19 }
 0x131   :  { %v277_v24 = vsub.f32 1.0, %v276_v21  ;;  %v274_v25 = vadd.f32 1.0, %v509_v22  ;;  %vm297_vm12 = vmor %vm295_vm10, %vm296_vm7  ;;  %v314_v53 = vand.u32 2147483647, %v273_v19  ;;  %vm310_vm15 = vweird.f32 %v273_v19 }
 0x132   :  { %v292_v28 = vsub.f32 1.0, %v291_v23  ;;  %v317_v60 = vor.u32 1.1754944e-38, %v316_v48 }
 0x133   :  { %v278_v29 = vmul.f32 %v505_v18, %v277_v24  ;;  %512 = vrcp.f32 %v274_v25  ;;  %v331_v59 = vand.u32 2147483648, %v274_v25  ;;  %v329_v61 = vand.u32 2147483647, %v274_v25 }
 0x134   :  { %v293_v31 = vmul.f32 %v507_v20, %v292_v28  ;;  %vm315_vm2 = vcmp.eq.f32.partialorder %v314_v53, 8.507059e+37  ;;  %vm325_vm3 = vweird.f32 %v274_v25 }
 0x135   :  { %v279_v33 = vadd.f32 %v505_v18, %v278_v29  ;;  %v332_v2 = vor.u32 1.1754944e-38, %v331_v59  ;;  %vm330_vm5 = vcmp.eq.f32.partialorder %v329_v61, 8.507059e+37 }
 0x136   :  { %v511_v34 = vpop.eup %510  ;;  %v294_v36 = vadd.f32 %v507_v20, %v293_v31 }
 0x137   :  { %v283_v37 = vsel %vm282_vm9, %v505_v18, %v279_v33  ;;  %v306_v39 = vmul.f32 %v511_v34, %v273_v19  ;;  %vm311_vm14 = vweird.f32 %v511_v34 }
 0x138   :  { %v288_v40 = vsel %vm285_vm11, %v287_v35, %v283_v37  ;;  %v298_v41 = vsel %vm297_vm12, %v507_v20, %v294_v36  ;;  %vm312_vm0 = vmor %vm310_vm15, %vm311_vm14 }
 0x139   :  { %v513_v43 = vpop.eup %512  ;;  %v335_v44 = vmul.f32 %v288_v40, %v753_v57  ;;  %v303_v45 = vsel %vm300_vm13, %v302_v38, %v298_v41  ;;  %v307_v46 = vsub.f32 1.0, %v306_v39 }
 0x13a   :  { %v336_v47 = vmul.f32 %v303_v45, %v755_v58  ;;  %v321_v49 = vmul.f32 %v513_v43, %v274_v25  ;;  %vm326_vm1 = vweird.f32 %v513_v43 }
 0x13b   :  { %v339_v50 = vmul.f32 %v335_v44, %v230_v42  ;;  %v308_v52 = vmul.f32 %v511_v34, %v307_v46  ;;  %vm327_vm4 = vmor %vm325_vm3, %vm326_vm1 }
 0x13c   :  { %v340_v54 = vmul.f32 %v336_v47, %v253_v51  ;;  %v322_v55 = vsub.f32 1.0, %v321_v49 }
 0x13d   :  { %v309_v56 = vadd.f32 %v511_v34, %v308_v52  ;;  %393 = vmatmul.f32.vlgmr.msrb.gmra.mxu0 %v339_v50 }
 0x13e   :  { %v323_v57 = vmul.f32 %v513_v43, %v322_v55  ;;  %416 = vmatmul.f32.vlgmr.msrb.gmra.mxu1 %v340_v54 }
 0x13f   :  { %v313_v58 = vsel %vm312_vm0, %v511_v34, %v309_v56 }
 0x140   :  { %v318_v62 = vsel %vm315_vm2, %v317_v60, %v313_v58  ;;  %v324_v63 = vadd.f32 %v513_v43, %v323_v57 }
 0x141   :  { %v337_v1 = vmul.f32 %v318_v62, %v759_v7 }
 0x142   :  { %v328_v3 = vsel %vm327_vm4, %v513_v43, %v324_v63 }
 0x143   :  { %v333_v5 = vsel %vm330_vm5, %v332_v2, %v328_v3  ;;  %v341_v9 = vmul.f32 %v337_v1, %v233_v4 }
 0x144   :  { %v338_v10 = vmul.f32 %v333_v5, %v761_v8 }
 0x145   :  { %396 = vmatmul.f32.vlgmr.msrb.gmra.mxu2 %v341_v9 }
 0x146   :  { %v342_v12 = vmul.f32 %v338_v10, %v256_v11 }
 0x148   :  { %419 = vmatmul.f32.vlgmr.msrb.gmra.mxu3 %v342_v12 }
 0x1ba   :  { %v394_v13 = vpop.f32.mrf.mxu0 }
 0x1bb   :  { %v417_v14 = vpop.f32.mrf.mxu1 }
 0x1bc   :  { %v418_v15 = vadd.f32 %v417_v14, %v394_v13 }
 0x1be   :  { %v423_v16 = vadd.f32 %v418_v15, %v641_v0 }
 0x1c0   :  { %432 = vst [vmem:[#allocation9] sm:$0xff] %v423_v16 }
 0x1c8   :  { %v397_v7 = vpop.f32.mrf.mxu2 }
 0x1cb   :  { %v420_v17 = vpop.f32.mrf.mxu3 }
 0x1cc   :  { %v421_v18 = vadd.f32 %v420_v17, %v397_v7 }
 0x1ce   :  { %v424_v8 = vadd.f32 %v421_v18, %v654_v6 }
 0x1d0   :  { %433 = vst [vmem:[#allocation9 + $0x8] sm:$0xff] %v424_v8 }
 0x1d1   :  { %446 = dma.vmem_to_hbm [thread:$0]  %s439_s21, 256, %s441_s24, [#allocation6], %s596_s30, %s596_s30, %s597_s6  }
 0x1d2   :  { %590 = dma.done.wait [#allocation6], 256  }
 0x1d3   :  { %591 = vsyncadd [#allocation6], 4294967040 }
 0x1d4   :  { %451 = vsyncpa [#allocation5], 1 }
 0x1d5   :  { %452 = vsyncpa [#allocation8], 1 }
 0x1d6   :  { %453 = vsyncpa [#allocation6], 1 }

</bundles_post_ra>
